<compile_context>
chip_gen: v5e
topology: v5e:2x2
jax: 0.10.0
libtpu: 0.0.40
codegen_flags: <defaults>
</compile_context>

<pallas_src>
import numpy as np
import jax
import jax.numpy as jnp
from jax import lax
from jax.experimental import pallas as pl
from jax.experimental.pallas import tpu as pltpu

IN_F = 11
OUT_F = 3


def _autoreg_kernel(x_ref,          # (T, N, F)   original sequence
                    wxs_ref,        # (F, 3H)     [Wxr|Wxz|Wxh], rows 3:6 & 8:11 zeroed
                    wu_ref,         # (3, 3H)     rows 3:6  of [Wxr|Wxz|Wxh]
                    wv_ref,         # (3, 3H)     rows 8:11 of [Wxr|Wxz|Wxh]
                    whzr_ref,       # (H, 2H)     [Whr|Whz]
                    whh_ref,        # (H, H)
                    bbig_ref,       # (1, 3H)     [br|bz|bh]
                    whead_ref,      # (H, OUT_F)
                    bhead_ref,      # (1, OUT_F)
                    out_ref,        # (T, N, OUT_F)
                    static_sc,      # (T, N, 3H)  precomputed x-side gate pre-activations
                    invdt_sc):      # (T, N, 1)   1/dt per step (index 0 unused)
    T, N, F = x_ref.shape
    H = whh_ref.shape[0]
    O = whead_ref.shape[1]

    # ---- hoist loop-invariant weights, pre-broadcast biases once ----
    w_xs = wxs_ref[...]
    w_u = wu_ref[...]
    w_v = wv_ref[...]
    w_hzr = whzr_ref[...]
    w_hh = whh_ref[...]
    w_head = whead_ref[...]
    b_big = jnp.broadcast_to(bbig_ref[...], (N, 3 * H))
    b_head = jnp.broadcast_to(bhead_ref[...], (N, O))

    # ---- precompute phase (entirely off the serial recurrence chain) ----
    # Static x-side contribution (+ gate biases) for every timestep, and the
    # per-step 1/dt.  Both depend only on the ORIGINAL sequence.  For large T
    # (v7x 64 MiB VMEM ceiling) this whole-sequence residency would move to a
    # time-chunked "arbitrary" grid with h/u carried in persistent scratch.
    prev_tcol = None
    for t in range(T):
        xt = x_ref[t]
        static_sc[t] = (
            jnp.dot(xt, w_xs, preferred_element_type=jnp.float32) + b_big)
        tcol = xt[:, 6:7]
        if t > 0:
            invdt_sc[t] = 1.0 / (tcol - prev_tcol)
        prev_tcol = tcol

    def gru_step(h, x_contrib):
        # x_contrib = [r_pre | z_pre | cand_pre] from the x side (+ biases).
        rz = jax.nn.sigmoid(
            x_contrib[:, :2 * H]
            + jnp.dot(h, w_hzr, preferred_element_type=jnp.float32))
        r = rz[:, :H]           # lanes 0:H -> feeds the next MXU push
        z = rz[:, H:]
        h_tilde = jnp.tanh(
            x_contrib[:, 2 * H:]
            + jnp.dot(h * r, w_hh, preferred_element_type=jnp.float32))
        h_new = z * h + (1.0 - z) * h_tilde
        u = jnp.dot(h_new, w_head, preferred_element_type=jnp.float32) + b_head
        return h_new, u

    # ---- step 0: fully original features, zero hidden state ----
    x0 = x_ref[0]
    xc0 = (static_sc[0]
           + jnp.dot(x0[:, 3:6], w_u, preferred_element_type=jnp.float32)
           + jnp.dot(x0[:, 8:11], w_v, preferred_element_type=jnp.float32))
    h0 = jnp.zeros((N, H), jnp.float32)
    h, u = gru_step(h0, xc0)
    out_ref[0] = u.astype(out_ref.dtype)

    # ---- steps 1..T-1: serial recurrence with autoregressive rewrite ----
    # Per step, only u_{t-1}-dependent work remains: v (VPU), two K=3 pushes,
    # the h-side pushes, activations, and the head.  out_ref is a whole-array
    # VMEM block, so HBM writeback happens once at kernel end.
    def body(t, carry):
        h, u_prev = carry
        xp = x_ref[t - 1]                         # original X_seq[t-1]
        v = (u_prev - xp[:, 3:6]) * invdt_sc[t]   # velocity estimate
        x_contrib = (static_sc[t]
                     + jnp.dot(u_prev, w_u, preferred_element_type=jnp.float32)
                     + jnp.dot(v, w_v, preferred_element_type=jnp.float32))
        h_new, u = gru_step(h, x_contrib)
        out_ref[t] = u.astype(out_ref.dtype)
        return (h_new, u)

    if T > 1:
        lax.fori_loop(1, T, body, (h, u), unroll=min(T - 1, 8))


def autoreg_u_pallas(x_seq, edge_index, params):
    """x_seq: [T, N, 11] float32.  edge_index is unused: K=1 ChebConv has no
    neighbor term, so the graph does not enter the math (matches PyTorch).

    Returns [T, N, 3] float32.
    """
    del edge_index  # K=1 ChebConv -> no neighbor aggregation
    T, N, F = x_seq.shape
    assert F == IN_F
    H = params["wxz"].shape[1]

    # One-time wrapper-side weight packing:
    #   x side : x @ [Wxr|Wxz|Wxh] -> [r_pre | z_pre | cand_pre]   (3H lanes)
    #   h side : h @ [Whr|Whz]     -> [r_pre | z_pre]
    #   cand   : (h*r) @ Whh
    w_x = jnp.concatenate([params["wxr"], params["wxz"], params["wxh"]], axis=1)
    row = jnp.arange(F)[:, None]
    dyn_rows = ((row >= 3) & (row < 6)) | ((row >= 8) & (row < 11))
    w_x_static = jnp.where(dyn_rows, 0.0, w_x)      # rows of rewritten cols zeroed
    w_u = w_x[3:6, :]                               # rewritten displacement cols
    w_v = w_x[8:11, :]                              # rewritten velocity cols
    w_h_zr = jnp.concatenate([params["whr"], params["whz"]], axis=1)
    b_big = jnp.concatenate([params["br"], params["bz"], params["bh"]], axis=1)

    vmem = pl.BlockSpec(memory_space=pltpu.MemorySpace.VMEM)

    # Whole-sequence VMEM residency (tiny: <100 KiB here).  For B independent
    # sequences, stack them along N (and/or add a leading "parallel" grid
    # axis) to fill the 256-wide MXU and v7x's second TensorCore.
    return pl.pallas_call(
        _autoreg_kernel,
        out_shape=jax.ShapeDtypeStruct((T, N, OUT_F), jnp.float32),
        in_specs=[vmem] * 9,
        out_specs=vmem,
        scratch_shapes=[pltpu.VMEM((T, N, 3 * H), jnp.float32),
                        pltpu.VMEM((T, N, 1), jnp.float32)],
    )(x_seq, w_x_static, w_u, w_v, w_h_zr, params["whh"], b_big,
      params["whead"], params["bhead"])


def autoreg_u_reference(x_seq, params):
    """Pure-JAX reference mirroring the PyTorch forward (for validation)."""
    T, N, _ = x_seq.shape
    hdim = params["wxz"].shape[1]
    X = [x_seq[t] for t in range(T)]
    h = jnp.zeros((N, hdim), jnp.float32)
    outs = []
    for t in range(T):
        xt = X[t]
        z = jax.nn.sigmoid(xt @ params["wxz"] + h @ params["whz"] + params["bz"])
        r = jax.nn.sigmoid(xt @ params["wxr"] + h @ params["whr"] + params["br"])
        h_tilde = jnp.tanh(xt @ params["wxh"] + (h * r) @ params["whh"] + params["bh"])
        h = z * h + (1.0 - z) * h_tilde
        u = h @ params["whead"] + params["bhead"]
        outs.append(u)
        if t < T - 1:
            dt = x_seq[t + 1][:, 6] - x_seq[t][:, 6]
            v = (u - x_seq[t][:, 3:6]) / dt[:, None]
            nxt = X[t + 1]
            nxt = nxt.at[:, 3:6].set(u)
            nxt = nxt.at[:, 8:11].set(v)
            X[t + 1] = nxt
    return jnp.stack(outs)


def init_params(key, in_f=IN_F, h=32, out_f=OUT_F):
    ks = jax.random.split(key, 11)
    s = 0.2
    return {
        "wxz": s * jax.random.normal(ks[0], (in_f, h), jnp.float32),
        "whz": s * jax.random.normal(ks[1], (h, h), jnp.float32),
        "bz": s * jax.random.normal(ks[2], (1, h), jnp.float32),
        "wxr": s * jax.random.normal(ks[3], (in_f, h), jnp.float32),
        "whr": s * jax.random.normal(ks[4], (h, h), jnp.float32),
        "br": s * jax.random.normal(ks[5], (1, h), jnp.float32),
        "wxh": s * jax.random.normal(ks[6], (in_f, h), jnp.float32),
        "whh": s * jax.random.normal(ks[7], (h, h), jnp.float32),
        "bh": s * jax.random.normal(ks[8], (1, h), jnp.float32),
        "whead": s * jax.random.normal(ks[9], (h, out_f), jnp.float32),
        "bhead": s * jax.random.normal(ks[10], (1, out_f), jnp.float32),
    }


if __name__ == "__main__":
    T, N, H = 6, 16, 32
    key = jax.random.PRNGKey(0)
    k_x, k_p = jax.random.split(key)

    x_seq = jax.random.normal(k_x, (T, N, IN_F), jnp.float32)
    # column 6 is "time": make it strictly increasing so dt > 0
    times = 0.05 + 0.1 * jnp.arange(T, dtype=jnp.float32)
    x_seq = x_seq.at[:, :, 6].set(jnp.broadcast_to(times[:, None], (T, N)))

    # Simple bidirectional ring graph (mirrors build_edge_index output shape);
    # unused in compute because K=1 ChebConv has no neighbor term.
    src = np.arange(N, dtype=np.int32)
    dst = (src + 1) % N
    edge_index = jnp.asarray(
        np.stack([np.concatenate([src, dst]), np.concatenate([dst, src])]),
        dtype=jnp.int32)

    params = init_params(k_p, h=H)

    out = autoreg_u_pallas(x_seq, edge_index, params)
    out = jax.block_until_ready(out)

    ref = autoreg_u_reference(x_seq, params)
    np.testing.assert_allclose(np.asarray(out), np.asarray(ref),
                               rtol=1e-4, atol=1e-4)

    print("KERNEL_OK")
</pallas_src>

<mosaic_0001>
module attributes {stable_mosaic.version = 11 : i64} {
  func.func @_autoreg_kernel(%arg0: memref<6x16x11xf32, #tpu.memory_space<vmem>>, %arg1: memref<11x96xf32, #tpu.memory_space<vmem>>, %arg2: memref<3x96xf32, #tpu.memory_space<vmem>>, %arg3: memref<3x96xf32, #tpu.memory_space<vmem>>, %arg4: memref<32x64xf32, #tpu.memory_space<vmem>>, %arg5: memref<32x32xf32, #tpu.memory_space<vmem>>, %arg6: memref<1x96xf32, #tpu.memory_space<vmem>>, %arg7: memref<32x3xf32, #tpu.memory_space<vmem>>, %arg8: memref<1x3xf32, #tpu.memory_space<vmem>>, %arg9: memref<6x16x3xf32, #tpu.memory_space<vmem>>, %arg10: memref<6x16x96xf32, #tpu.memory_space<vmem>>, %arg11: memref<6x16x1xf32, #tpu.memory_space<vmem>>) attributes {dimension_semantics = [], scalar_prefetch = 0 : i64, scratch_operands = 2 : i64, tpu.core_type = #tpu.core_type<tc>} {
    %c0 = arith.constant 0 : index
    %c0_0 = arith.constant 0 : index
    %0 = vector.load %arg1[%c0, %c0_0] : memref<11x96xf32, #tpu.memory_space<vmem>>, vector<11x96xf32>
    %c0_1 = arith.constant 0 : index
    %c0_2 = arith.constant 0 : index
    %1 = vector.load %arg2[%c0_1, %c0_2] : memref<3x96xf32, #tpu.memory_space<vmem>>, vector<3x96xf32>
    %c0_3 = arith.constant 0 : index
    %c0_4 = arith.constant 0 : index
    %2 = vector.load %arg3[%c0_3, %c0_4] : memref<3x96xf32, #tpu.memory_space<vmem>>, vector<3x96xf32>
    %c0_5 = arith.constant 0 : index
    %c0_6 = arith.constant 0 : index
    %3 = vector.load %arg4[%c0_5, %c0_6] : memref<32x64xf32, #tpu.memory_space<vmem>>, vector<32x64xf32>
    %c0_7 = arith.constant 0 : index
    %c0_8 = arith.constant 0 : index
    %4 = vector.load %arg5[%c0_7, %c0_8] : memref<32x32xf32, #tpu.memory_space<vmem>>, vector<32x32xf32>
    %c0_9 = arith.constant 0 : index
    %c0_10 = arith.constant 0 : index
    %5 = vector.load %arg7[%c0_9, %c0_10] : memref<32x3xf32, #tpu.memory_space<vmem>>, vector<32x3xf32>
    %c0_11 = arith.constant 0 : index
    %c0_12 = arith.constant 0 : index
    %6 = vector.load %arg6[%c0_11, %c0_12] : memref<1x96xf32, #tpu.memory_space<vmem>>, vector<1x96xf32>
    %7 = vector.shape_cast %6 : vector<1x96xf32> to vector<1x96xf32>
    %8 = vector.broadcast %7 : vector<1x96xf32> to vector<16x96xf32>
    %c0_13 = arith.constant 0 : index
    %c0_14 = arith.constant 0 : index
    %9 = vector.load %arg8[%c0_13, %c0_14] : memref<1x3xf32, #tpu.memory_space<vmem>>, vector<1x3xf32>
    %10 = vector.shape_cast %9 : vector<1x3xf32> to vector<1x3xf32>
    %11 = vector.broadcast %10 : vector<1x3xf32> to vector<16x3xf32>
    %c0_15 = arith.constant 0 : index
    %c0_16 = arith.constant 0 : index
    %c0_17 = arith.constant 0 : index
    %12 = vector.load %arg0[%c0_15, %c0_16, %c0_17] : memref<6x16x11xf32, #tpu.memory_space<vmem>>, vector<1x16x11xf32>
    %13 = vector.shape_cast %12 : vector<1x16x11xf32> to vector<16x11xf32>
    %cst = arith.constant dense<0.000000e+00> : vector<16x96xf32>
    %14 = tpu.matmul %13, %0, %cst {dimension_numbers = #tpu.dot_dimension_numbers<[1], [0], [0], [1], [0, 0, 1, 1], [], []>} : vector<16x11xf32>, vector<11x96xf32>, vector<16x96xf32> -> vector<16x96xf32>
    %15 = arith.addf %14, %8 : vector<16x96xf32>
    %c0_18 = arith.constant 0 : index
    %c0_19 = arith.constant 0 : index
    %c0_20 = arith.constant 0 : index
    %16 = vector.load %arg10[%c0_18, %c0_19, %c0_20] : memref<6x16x96xf32, #tpu.memory_space<vmem>>, vector<1x16x96xf32>
    %17 = vector.shape_cast %16 : vector<1x16x96xf32> to vector<16x96xf32>
    %18 = vector.shape_cast %15 : vector<16x96xf32> to vector<1x16x96xf32>
    tpu.vector_store %arg10[%c0_18, %c0_19, %c0_20], %18 {strides = array<i32>} : memref<6x16x96xf32, #tpu.memory_space<vmem>>, vector<1x16x96xf32>,
    %19 = vector.extract_strided_slice %13 {offsets = [0, 6], sizes = [16, 1], strides = [1, 1]} : vector<16x11xf32> to vector<16x1xf32>
    %c1 = arith.constant 1 : index
    %c0_21 = arith.constant 0 : index
    %c0_22 = arith.constant 0 : index
    %20 = vector.load %arg0[%c1, %c0_21, %c0_22] : memref<6x16x11xf32, #tpu.memory_space<vmem>>, vector<1x16x11xf32>
    %21 = vector.shape_cast %20 : vector<1x16x11xf32> to vector<16x11xf32>
    %cst_23 = arith.constant dense<0.000000e+00> : vector<16x96xf32>
    %22 = tpu.matmul %21, %0, %cst_23 {dimension_numbers = #tpu.dot_dimension_numbers<[1], [0], [0], [1], [0, 0, 1, 1], [], []>} : vector<16x11xf32>, vector<11x96xf32>, vector<16x96xf32> -> vector<16x96xf32>
    %23 = arith.addf %22, %8 : vector<16x96xf32>
    %c1_24 = arith.constant 1 : index
    %c0_25 = arith.constant 0 : index
    %c0_26 = arith.constant 0 : index
    %24 = vector.load %arg10[%c1_24, %c0_25, %c0_26] : memref<6x16x96xf32, #tpu.memory_space<vmem>>, vector<1x16x96xf32>
    %25 = vector.shape_cast %24 : vector<1x16x96xf32> to vector<16x96xf32>
    %26 = vector.shape_cast %23 : vector<16x96xf32> to vector<1x16x96xf32>
    tpu.vector_store %arg10[%c1_24, %c0_25, %c0_26], %26 {strides = array<i32>} : memref<6x16x96xf32, #tpu.memory_space<vmem>>, vector<1x16x96xf32>,
    %27 = vector.extract_strided_slice %21 {offsets = [0, 6], sizes = [16, 1], strides = [1, 1]} : vector<16x11xf32> to vector<16x1xf32>
    %28 = arith.subf %27, %19 : vector<16x1xf32>
    %cst_27 = arith.constant 1.000000e+00 : f32
    %29 = vector.broadcast %cst_27 : f32 to vector<16x1xf32>
    %30 = arith.divf %29, %28 : vector<16x1xf32>
    %c1_28 = arith.constant 1 : index
    %c0_29 = arith.constant 0 : index
    %c0_30 = arith.constant 0 : index
    %31 = vector.load %arg11[%c1_28, %c0_29, %c0_30] : memref<6x16x1xf32, #tpu.memory_space<vmem>>, vector<1x16x1xf32>
    %32 = vector.shape_cast %31 : vector<1x16x1xf32> to vector<16x1xf32>
    %33 = vector.shape_cast %30 : vector<16x1xf32> to vector<1x16x1xf32>
    tpu.vector_store %arg11[%c1_28, %c0_29, %c0_30], %33 {strides = array<i32>} : memref<6x16x1xf32, #tpu.memory_space<vmem>>, vector<1x16x1xf32>,
    %c2 = arith.constant 2 : index
    %c0_31 = arith.constant 0 : index
    %c0_32 = arith.constant 0 : index
    %34 = vector.load %arg0[%c2, %c0_31, %c0_32] : memref<6x16x11xf32, #tpu.memory_space<vmem>>, vector<1x16x11xf32>
    %35 = vector.shape_cast %34 : vector<1x16x11xf32> to vector<16x11xf32>
    %cst_33 = arith.constant dense<0.000000e+00> : vector<16x96xf32>
    %36 = tpu.matmul %35, %0, %cst_33 {dimension_numbers = #tpu.dot_dimension_numbers<[1], [0], [0], [1], [0, 0, 1, 1], [], []>} : vector<16x11xf32>, vector<11x96xf32>, vector<16x96xf32> -> vector<16x96xf32>
    %37 = arith.addf %36, %8 : vector<16x96xf32>
    %c2_34 = arith.constant 2 : index
    %c0_35 = arith.constant 0 : index
    %c0_36 = arith.constant 0 : index
    %38 = vector.load %arg10[%c2_34, %c0_35, %c0_36] : memref<6x16x96xf32, #tpu.memory_space<vmem>>, vector<1x16x96xf32>
    %39 = vector.shape_cast %38 : vector<1x16x96xf32> to vector<16x96xf32>
    %40 = vector.shape_cast %37 : vector<16x96xf32> to vector<1x16x96xf32>
    tpu.vector_store %arg10[%c2_34, %c0_35, %c0_36], %40 {strides = array<i32>} : memref<6x16x96xf32, #tpu.memory_space<vmem>>, vector<1x16x96xf32>,
    %41 = vector.extract_strided_slice %35 {offsets = [0, 6], sizes = [16, 1], strides = [1, 1]} : vector<16x11xf32> to vector<16x1xf32>
    %42 = arith.subf %41, %27 : vector<16x1xf32>
    %cst_37 = arith.constant 1.000000e+00 : f32
    %43 = vector.broadcast %cst_37 : f32 to vector<16x1xf32>
    %44 = arith.divf %43, %42 : vector<16x1xf32>
    %c2_38 = arith.constant 2 : index
    %c0_39 = arith.constant 0 : index
    %c0_40 = arith.constant 0 : index
    %45 = vector.load %arg11[%c2_38, %c0_39, %c0_40] : memref<6x16x1xf32, #tpu.memory_space<vmem>>, vector<1x16x1xf32>
    %46 = vector.shape_cast %45 : vector<1x16x1xf32> to vector<16x1xf32>
    %47 = vector.shape_cast %44 : vector<16x1xf32> to vector<1x16x1xf32>
    tpu.vector_store %arg11[%c2_38, %c0_39, %c0_40], %47 {strides = array<i32>} : memref<6x16x1xf32, #tpu.memory_space<vmem>>, vector<1x16x1xf32>,
    %c3 = arith.constant 3 : index
    %c0_41 = arith.constant 0 : index
    %c0_42 = arith.constant 0 : index
    %48 = vector.load %arg0[%c3, %c0_41, %c0_42] : memref<6x16x11xf32, #tpu.memory_space<vmem>>, vector<1x16x11xf32>
    %49 = vector.shape_cast %48 : vector<1x16x11xf32> to vector<16x11xf32>
    %cst_43 = arith.constant dense<0.000000e+00> : vector<16x96xf32>
    %50 = tpu.matmul %49, %0, %cst_43 {dimension_numbers = #tpu.dot_dimension_numbers<[1], [0], [0], [1], [0, 0, 1, 1], [], []>} : vector<16x11xf32>, vector<11x96xf32>, vector<16x96xf32> -> vector<16x96xf32>
    %51 = arith.addf %50, %8 : vector<16x96xf32>
    %c3_44 = arith.constant 3 : index
    %c0_45 = arith.constant 0 : index
    %c0_46 = arith.constant 0 : index
    %52 = vector.load %arg10[%c3_44, %c0_45, %c0_46] : memref<6x16x96xf32, #tpu.memory_space<vmem>>, vector<1x16x96xf32>
    %53 = vector.shape_cast %52 : vector<1x16x96xf32> to vector<16x96xf32>
    %54 = vector.shape_cast %51 : vector<16x96xf32> to vector<1x16x96xf32>
    tpu.vector_store %arg10[%c3_44, %c0_45, %c0_46], %54 {strides = array<i32>} : memref<6x16x96xf32, #tpu.memory_space<vmem>>, vector<1x16x96xf32>,
    %55 = vector.extract_strided_slice %49 {offsets = [0, 6], sizes = [16, 1], strides = [1, 1]} : vector<16x11xf32> to vector<16x1xf32>
    %56 = arith.subf %55, %41 : vector<16x1xf32>
    %cst_47 = arith.constant 1.000000e+00 : f32
    %57 = vector.broadcast %cst_47 : f32 to vector<16x1xf32>
    %58 = arith.divf %57, %56 : vector<16x1xf32>
    %c3_48 = arith.constant 3 : index
    %c0_49 = arith.constant 0 : index
    %c0_50 = arith.constant 0 : index
    %59 = vector.load %arg11[%c3_48, %c0_49, %c0_50] : memref<6x16x1xf32, #tpu.memory_space<vmem>>, vector<1x16x1xf32>
    %60 = vector.shape_cast %59 : vector<1x16x1xf32> to vector<16x1xf32>
    %61 = vector.shape_cast %58 : vector<16x1xf32> to vector<1x16x1xf32>
    tpu.vector_store %arg11[%c3_48, %c0_49, %c0_50], %61 {strides = array<i32>} : memref<6x16x1xf32, #tpu.memory_space<vmem>>, vector<1x16x1xf32>,
    %c4 = arith.constant 4 : index
    %c0_51 = arith.constant 0 : index
    %c0_52 = arith.constant 0 : index
    %62 = vector.load %arg0[%c4, %c0_51, %c0_52] : memref<6x16x11xf32, #tpu.memory_space<vmem>>, vector<1x16x11xf32>
    %63 = vector.shape_cast %62 : vector<1x16x11xf32> to vector<16x11xf32>
    %cst_53 = arith.constant dense<0.000000e+00> : vector<16x96xf32>
    %64 = tpu.matmul %63, %0, %cst_53 {dimension_numbers = #tpu.dot_dimension_numbers<[1], [0], [0], [1], [0, 0, 1, 1], [], []>} : vector<16x11xf32>, vector<11x96xf32>, vector<16x96xf32> -> vector<16x96xf32>
    %65 = arith.addf %64, %8 : vector<16x96xf32>
    %c4_54 = arith.constant 4 : index
    %c0_55 = arith.constant 0 : index
    %c0_56 = arith.constant 0 : index
    %66 = vector.load %arg10[%c4_54, %c0_55, %c0_56] : memref<6x16x96xf32, #tpu.memory_space<vmem>>, vector<1x16x96xf32>
    %67 = vector.shape_cast %66 : vector<1x16x96xf32> to vector<16x96xf32>
    %68 = vector.shape_cast %65 : vector<16x96xf32> to vector<1x16x96xf32>
    tpu.vector_store %arg10[%c4_54, %c0_55, %c0_56], %68 {strides = array<i32>} : memref<6x16x96xf32, #tpu.memory_space<vmem>>, vector<1x16x96xf32>,
    %69 = vector.extract_strided_slice %63 {offsets = [0, 6], sizes = [16, 1], strides = [1, 1]} : vector<16x11xf32> to vector<16x1xf32>
    %70 = arith.subf %69, %55 : vector<16x1xf32>
    %cst_57 = arith.constant 1.000000e+00 : f32
    %71 = vector.broadcast %cst_57 : f32 to vector<16x1xf32>
    %72 = arith.divf %71, %70 : vector<16x1xf32>
    %c4_58 = arith.constant 4 : index
    %c0_59 = arith.constant 0 : index
    %c0_60 = arith.constant 0 : index
    %73 = vector.load %arg11[%c4_58, %c0_59, %c0_60] : memref<6x16x1xf32, #tpu.memory_space<vmem>>, vector<1x16x1xf32>
    %74 = vector.shape_cast %73 : vector<1x16x1xf32> to vector<16x1xf32>
    %75 = vector.shape_cast %72 : vector<16x1xf32> to vector<1x16x1xf32>
    tpu.vector_store %arg11[%c4_58, %c0_59, %c0_60], %75 {strides = array<i32>} : memref<6x16x1xf32, #tpu.memory_space<vmem>>, vector<1x16x1xf32>,
    %c5 = arith.constant 5 : index
    %c0_61 = arith.constant 0 : index
    %c0_62 = arith.constant 0 : index
    %76 = vector.load %arg0[%c5, %c0_61, %c0_62] : memref<6x16x11xf32, #tpu.memory_space<vmem>>, vector<1x16x11xf32>
    %77 = vector.shape_cast %76 : vector<1x16x11xf32> to vector<16x11xf32>
    %cst_63 = arith.constant dense<0.000000e+00> : vector<16x96xf32>
    %78 = tpu.matmul %77, %0, %cst_63 {dimension_numbers = #tpu.dot_dimension_numbers<[1], [0], [0], [1], [0, 0, 1, 1], [], []>} : vector<16x11xf32>, vector<11x96xf32>, vector<16x96xf32> -> vector<16x96xf32>
    %79 = arith.addf %78, %8 : vector<16x96xf32>
    %c5_64 = arith.constant 5 : index
    %c0_65 = arith.constant 0 : index
    %c0_66 = arith.constant 0 : index
    %80 = vector.load %arg10[%c5_64, %c0_65, %c0_66] : memref<6x16x96xf32, #tpu.memory_space<vmem>>, vector<1x16x96xf32>
    %81 = vector.shape_cast %80 : vector<1x16x96xf32> to vector<16x96xf32>
    %82 = vector.shape_cast %79 : vector<16x96xf32> to vector<1x16x96xf32>
    tpu.vector_store %arg10[%c5_64, %c0_65, %c0_66], %82 {strides = array<i32>} : memref<6x16x96xf32, #tpu.memory_space<vmem>>, vector<1x16x96xf32>,
    %83 = vector.extract_strided_slice %77 {offsets = [0, 6], sizes = [16, 1], strides = [1, 1]} : vector<16x11xf32> to vector<16x1xf32>
    %84 = arith.subf %83, %69 : vector<16x1xf32>
    %cst_67 = arith.constant 1.000000e+00 : f32
    %85 = vector.broadcast %cst_67 : f32 to vector<16x1xf32>
    %86 = arith.divf %85, %84 : vector<16x1xf32>
    %c5_68 = arith.constant 5 : index
    %c0_69 = arith.constant 0 : index
    %c0_70 = arith.constant 0 : index
    %87 = vector.load %arg11[%c5_68, %c0_69, %c0_70] : memref<6x16x1xf32, #tpu.memory_space<vmem>>, vector<1x16x1xf32>
    %88 = vector.shape_cast %87 : vector<1x16x1xf32> to vector<16x1xf32>
    %89 = vector.shape_cast %86 : vector<16x1xf32> to vector<1x16x1xf32>
    tpu.vector_store %arg11[%c5_68, %c0_69, %c0_70], %89 {strides = array<i32>} : memref<6x16x1xf32, #tpu.memory_space<vmem>>, vector<1x16x1xf32>,
    %c0_71 = arith.constant 0 : index
    %c0_72 = arith.constant 0 : index
    %c0_73 = arith.constant 0 : index
    %90 = vector.load %arg0[%c0_71, %c0_72, %c0_73] : memref<6x16x11xf32, #tpu.memory_space<vmem>>, vector<1x16x11xf32>
    %91 = vector.shape_cast %90 : vector<1x16x11xf32> to vector<16x11xf32>
    %c0_74 = arith.constant 0 : index
    %c0_75 = arith.constant 0 : index
    %c0_76 = arith.constant 0 : index
    %92 = vector.load %arg10[%c0_74, %c0_75, %c0_76] : memref<6x16x96xf32, #tpu.memory_space<vmem>>, vector<1x16x96xf32>
    %93 = vector.shape_cast %92 : vector<1x16x96xf32> to vector<16x96xf32>
    %94 = vector.extract_strided_slice %91 {offsets = [0, 3], sizes = [16, 3], strides = [1, 1]} : vector<16x11xf32> to vector<16x3xf32>
    %cst_77 = arith.constant dense<0.000000e+00> : vector<16x96xf32>
    %95 = tpu.matmul %94, %1, %cst_77 {dimension_numbers = #tpu.dot_dimension_numbers<[1], [0], [0], [1], [0, 0, 1, 1], [], []>} : vector<16x3xf32>, vector<3x96xf32>, vector<16x96xf32> -> vector<16x96xf32>
    %96 = arith.addf %93, %95 : vector<16x96xf32>
    %97 = vector.extract_strided_slice %91 {offsets = [0, 8], sizes = [16, 3], strides = [1, 1]} : vector<16x11xf32> to vector<16x3xf32>
    %cst_78 = arith.constant dense<0.000000e+00> : vector<16x96xf32>
    %98 = tpu.matmul %97, %2, %cst_78 {dimension_numbers = #tpu.dot_dimension_numbers<[1], [0], [0], [1], [0, 0, 1, 1], [], []>} : vector<16x3xf32>, vector<3x96xf32>, vector<16x96xf32> -> vector<16x96xf32>
    %99 = arith.addf %96, %98 : vector<16x96xf32>
    %cst_79 = arith.constant 0.000000e+00 : f32
    %100 = vector.broadcast %cst_79 : f32 to vector<16x32xf32>
    %101 = vector.extract_strided_slice %99 {offsets = [0, 0], sizes = [16, 64], strides = [1, 1]} : vector<16x96xf32> to vector<16x64xf32>
    %cst_80 = arith.constant dense<0.000000e+00> : vector<16x64xf32>
    %102 = tpu.matmul %100, %3, %cst_80 {dimension_numbers = #tpu.dot_dimension_numbers<[1], [0], [0], [1], [0, 0, 1, 1], [], []>} : vector<16x32xf32>, vector<32x64xf32>, vector<16x64xf32> -> vector<16x64xf32>
    %103 = arith.addf %101, %102 : vector<16x64xf32>
    %104 = arith.negf %103 : vector<16x64xf32>
    %105 = math.exp %104 : vector<16x64xf32>
    %cst_81 = arith.constant 1.000000e+00 : f32
    %106 = vector.broadcast %cst_81 : f32 to vector<16x64xf32>
    %107 = arith.addf %106, %105 : vector<16x64xf32>
    %108 = arith.divf %106, %107 : vector<16x64xf32>
    %109 = vector.extract_strided_slice %108 {offsets = [0, 0], sizes = [16, 32], strides = [1, 1]} : vector<16x64xf32> to vector<16x32xf32>
    %110 = vector.extract_strided_slice %108 {offsets = [0, 32], sizes = [16, 32], strides = [1, 1]} : vector<16x64xf32> to vector<16x32xf32>
    %111 = vector.extract_strided_slice %99 {offsets = [0, 64], sizes = [16, 32], strides = [1, 1]} : vector<16x96xf32> to vector<16x32xf32>
    %112 = arith.mulf %100, %109 : vector<16x32xf32>
    %cst_82 = arith.constant dense<0.000000e+00> : vector<16x32xf32>
    %113 = tpu.matmul %112, %4, %cst_82 {dimension_numbers = #tpu.dot_dimension_numbers<[1], [0], [0], [1], [0, 0, 1, 1], [], []>} : vector<16x32xf32>, vector<32x32xf32>, vector<16x32xf32> -> vector<16x32xf32>
    %114 = arith.addf %111, %113 : vector<16x32xf32>
    %115 = math.tanh %114 : vector<16x32xf32>
    %116 = arith.mulf %110, %100 : vector<16x32xf32>
    %cst_83 = arith.constant 1.000000e+00 : f32
    %117 = vector.broadcast %cst_83 : f32 to vector<16x32xf32>
    %118 = arith.subf %117, %110 : vector<16x32xf32>
    %119 = arith.mulf %118, %115 : vector<16x32xf32>
    %120 = arith.addf %116, %119 : vector<16x32xf32>
    %cst_84 = arith.constant dense<0.000000e+00> : vector<16x3xf32>
    %121 = tpu.matmul %120, %5, %cst_84 {dimension_numbers = #tpu.dot_dimension_numbers<[1], [0], [0], [1], [0, 0, 1, 1], [], []>} : vector<16x32xf32>, vector<32x3xf32>, vector<16x3xf32> -> vector<16x3xf32>
    %122 = arith.addf %121, %11 : vector<16x3xf32>
    %c0_85 = arith.constant 0 : index
    %c0_86 = arith.constant 0 : index
    %c0_87 = arith.constant 0 : index
    %123 = vector.load %arg9[%c0_85, %c0_86, %c0_87] : memref<6x16x3xf32, #tpu.memory_space<vmem>>, vector<1x16x3xf32>
    %124 = vector.shape_cast %123 : vector<1x16x3xf32> to vector<16x3xf32>
    %125 = vector.shape_cast %122 : vector<16x3xf32> to vector<1x16x3xf32>
    tpu.vector_store %arg9[%c0_85, %c0_86, %c0_87], %125 {strides = array<i32>} : memref<6x16x3xf32, #tpu.memory_space<vmem>>, vector<1x16x3xf32>,
    %c1_i32 = arith.constant 1 : i32
    %c1_i32_88 = arith.constant 1 : i32
    %126 = arith.subi %c1_i32, %c1_i32_88 : i32
    %127 = arith.index_cast %126 : i32 to index
    %c0_89 = arith.constant 0 : index
    %c0_90 = arith.constant 0 : index
    %128 = vector.load %arg0[%127, %c0_89, %c0_90] : memref<6x16x11xf32, #tpu.memory_space<vmem>>, vector<1x16x11xf32>
    %129 = vector.shape_cast %128 : vector<1x16x11xf32> to vector<16x11xf32>
    %130 = vector.extract_strided_slice %129 {offsets = [0, 3], sizes = [16, 3], strides = [1, 1]} : vector<16x11xf32> to vector<16x3xf32>
    %131 = arith.subf %122, %130 : vector<16x3xf32>
    %132 = arith.index_cast %c1_i32 : i32 to index
    %c0_91 = arith.constant 0 : index
    %c0_92 = arith.constant 0 : index
    %133 = vector.load %arg11[%132, %c0_91, %c0_92] : memref<6x16x1xf32, #tpu.memory_space<vmem>>, vector<1x16x1xf32>
    %134 = vector.shape_cast %133 : vector<1x16x1xf32> to vector<16x1xf32>
    %135 = vector.broadcast %134 : vector<16x1xf32> to vector<16x3xf32>
    %136 = arith.mulf %131, %135 : vector<16x3xf32>
    %137 = arith.index_cast %c1_i32 : i32 to index
    %c0_93 = arith.constant 0 : index
    %c0_94 = arith.constant 0 : index
    %138 = vector.load %arg10[%137, %c0_93, %c0_94] : memref<6x16x96xf32, #tpu.memory_space<vmem>>, vector<1x16x96xf32>
    %139 = vector.shape_cast %138 : vector<1x16x96xf32> to vector<16x96xf32>
    %cst_95 = arith.constant dense<0.000000e+00> : vector<16x96xf32>
    %140 = tpu.matmul %122, %1, %cst_95 {dimension_numbers = #tpu.dot_dimension_numbers<[1], [0], [0], [1], [0, 0, 1, 1], [], []>} : vector<16x3xf32>, vector<3x96xf32>, vector<16x96xf32> -> vector<16x96xf32>
    %141 = arith.addf %139, %140 : vector<16x96xf32>
    %cst_96 = arith.constant dense<0.000000e+00> : vector<16x96xf32>
    %142 = tpu.matmul %136, %2, %cst_96 {dimension_numbers = #tpu.dot_dimension_numbers<[1], [0], [0], [1], [0, 0, 1, 1], [], []>} : vector<16x3xf32>, vector<3x96xf32>, vector<16x96xf32> -> vector<16x96xf32>
    %143 = arith.addf %141, %142 : vector<16x96xf32>
    %144 = vector.extract_strided_slice %143 {offsets = [0, 0], sizes = [16, 64], strides = [1, 1]} : vector<16x96xf32> to vector<16x64xf32>
    %cst_97 = arith.constant dense<0.000000e+00> : vector<16x64xf32>
    %145 = tpu.matmul %120, %3, %cst_97 {dimension_numbers = #tpu.dot_dimension_numbers<[1], [0], [0], [1], [0, 0, 1, 1], [], []>} : vector<16x32xf32>, vector<32x64xf32>, vector<16x64xf32> -> vector<16x64xf32>
    %146 = arith.addf %144, %145 : vector<16x64xf32>
    %147 = arith.negf %146 : vector<16x64xf32>
    %148 = math.exp %147 : vector<16x64xf32>
    %cst_98 = arith.constant 1.000000e+00 : f32
    %149 = vector.broadcast %cst_98 : f32 to vector<16x64xf32>
    %150 = arith.addf %149, %148 : vector<16x64xf32>
    %151 = arith.divf %149, %150 : vector<16x64xf32>
    %152 = vector.extract_strided_slice %151 {offsets = [0, 0], sizes = [16, 32], strides = [1, 1]} : vector<16x64xf32> to vector<16x32xf32>
    %153 = vector.extract_strided_slice %151 {offsets = [0, 32], sizes = [16, 32], strides = [1, 1]} : vector<16x64xf32> to vector<16x32xf32>
    %154 = vector.extract_strided_slice %143 {offsets = [0, 64], sizes = [16, 32], strides = [1, 1]} : vector<16x96xf32> to vector<16x32xf32>
    %155 = arith.mulf %120, %152 : vector<16x32xf32>
    %cst_99 = arith.constant dense<0.000000e+00> : vector<16x32xf32>
    %156 = tpu.matmul %155, %4, %cst_99 {dimension_numbers = #tpu.dot_dimension_numbers<[1], [0], [0], [1], [0, 0, 1, 1], [], []>} : vector<16x32xf32>, vector<32x32xf32>, vector<16x32xf32> -> vector<16x32xf32>
    %157 = arith.addf %154, %156 : vector<16x32xf32>
    %158 = math.tanh %157 : vector<16x32xf32>
    %159 = arith.mulf %153, %120 : vector<16x32xf32>
    %cst_100 = arith.constant 1.000000e+00 : f32
    %160 = vector.broadcast %cst_100 : f32 to vector<16x32xf32>
    %161 = arith.subf %160, %153 : vector<16x32xf32>
    %162 = arith.mulf %161, %158 : vector<16x32xf32>
    %163 = arith.addf %159, %162 : vector<16x32xf32>
    %cst_101 = arith.constant dense<0.000000e+00> : vector<16x3xf32>
    %164 = tpu.matmul %163, %5, %cst_101 {dimension_numbers = #tpu.dot_dimension_numbers<[1], [0], [0], [1], [0, 0, 1, 1], [], []>} : vector<16x32xf32>, vector<32x3xf32>, vector<16x3xf32> -> vector<16x3xf32>
    %165 = arith.addf %164, %11 : vector<16x3xf32>
    %166 = arith.index_cast %c1_i32 : i32 to index
    %c0_102 = arith.constant 0 : index
    %c0_103 = arith.constant 0 : index
    %167 = vector.load %arg9[%166, %c0_102, %c0_103] : memref<6x16x3xf32, #tpu.memory_space<vmem>>, vector<1x16x3xf32>
    %168 = vector.shape_cast %167 : vector<1x16x3xf32> to vector<16x3xf32>
    %169 = vector.shape_cast %165 : vector<16x3xf32> to vector<1x16x3xf32>
    tpu.vector_store %arg9[%166, %c0_102, %c0_103], %169 {strides = array<i32>} : memref<6x16x3xf32, #tpu.memory_space<vmem>>, vector<1x16x3xf32>,
    %c2_i32 = arith.constant 2 : i32
    %c1_i32_104 = arith.constant 1 : i32
    %170 = arith.subi %c2_i32, %c1_i32_104 : i32
    %171 = arith.index_cast %170 : i32 to index
    %c0_105 = arith.constant 0 : index
    %c0_106 = arith.constant 0 : index
    %172 = vector.load %arg0[%171, %c0_105, %c0_106] : memref<6x16x11xf32, #tpu.memory_space<vmem>>, vector<1x16x11xf32>
    %173 = vector.shape_cast %172 : vector<1x16x11xf32> to vector<16x11xf32>
    %174 = vector.extract_strided_slice %173 {offsets = [0, 3], sizes = [16, 3], strides = [1, 1]} : vector<16x11xf32> to vector<16x3xf32>
    %175 = arith.subf %165, %174 : vector<16x3xf32>
    %176 = arith.index_cast %c2_i32 : i32 to index
    %c0_107 = arith.constant 0 : index
    %c0_108 = arith.constant 0 : index
    %177 = vector.load %arg11[%176, %c0_107, %c0_108] : memref<6x16x1xf32, #tpu.memory_space<vmem>>, vector<1x16x1xf32>
    %178 = vector.shape_cast %177 : vector<1x16x1xf32> to vector<16x1xf32>
    %179 = vector.broadcast %178 : vector<16x1xf32> to vector<16x3xf32>
    %180 = arith.mulf %175, %179 : vector<16x3xf32>
    %181 = arith.index_cast %c2_i32 : i32 to index
    %c0_109 = arith.constant 0 : index
    %c0_110 = arith.constant 0 : index
    %182 = vector.load %arg10[%181, %c0_109, %c0_110] : memref<6x16x96xf32, #tpu.memory_space<vmem>>, vector<1x16x96xf32>
    %183 = vector.shape_cast %182 : vector<1x16x96xf32> to vector<16x96xf32>
    %cst_111 = arith.constant dense<0.000000e+00> : vector<16x96xf32>
    %184 = tpu.matmul %165, %1, %cst_111 {dimension_numbers = #tpu.dot_dimension_numbers<[1], [0], [0], [1], [0, 0, 1, 1], [], []>} : vector<16x3xf32>, vector<3x96xf32>, vector<16x96xf32> -> vector<16x96xf32>
    %185 = arith.addf %183, %184 : vector<16x96xf32>
    %cst_112 = arith.constant dense<0.000000e+00> : vector<16x96xf32>
    %186 = tpu.matmul %180, %2, %cst_112 {dimension_numbers = #tpu.dot_dimension_numbers<[1], [0], [0], [1], [0, 0, 1, 1], [], []>} : vector<16x3xf32>, vector<3x96xf32>, vector<16x96xf32> -> vector<16x96xf32>
    %187 = arith.addf %185, %186 : vector<16x96xf32>
    %188 = vector.extract_strided_slice %187 {offsets = [0, 0], sizes = [16, 64], strides = [1, 1]} : vector<16x96xf32> to vector<16x64xf32>
    %cst_113 = arith.constant dense<0.000000e+00> : vector<16x64xf32>
    %189 = tpu.matmul %163, %3, %cst_113 {dimension_numbers = #tpu.dot_dimension_numbers<[1], [0], [0], [1], [0, 0, 1, 1], [], []>} : vector<16x32xf32>, vector<32x64xf32>, vector<16x64xf32> -> vector<16x64xf32>
    %190 = arith.addf %188, %189 : vector<16x64xf32>
    %191 = arith.negf %190 : vector<16x64xf32>
    %192 = math.exp %191 : vector<16x64xf32>
    %cst_114 = arith.constant 1.000000e+00 : f32
    %193 = vector.broadcast %cst_114 : f32 to vector<16x64xf32>
    %194 = arith.addf %193, %192 : vector<16x64xf32>
    %195 = arith.divf %193, %194 : vector<16x64xf32>
    %196 = vector.extract_strided_slice %195 {offsets = [0, 0], sizes = [16, 32], strides = [1, 1]} : vector<16x64xf32> to vector<16x32xf32>
    %197 = vector.extract_strided_slice %195 {offsets = [0, 32], sizes = [16, 32], strides = [1, 1]} : vector<16x64xf32> to vector<16x32xf32>
    %198 = vector.extract_strided_slice %187 {offsets = [0, 64], sizes = [16, 32], strides = [1, 1]} : vector<16x96xf32> to vector<16x32xf32>
    %199 = arith.mulf %163, %196 : vector<16x32xf32>
    %cst_115 = arith.constant dense<0.000000e+00> : vector<16x32xf32>
    %200 = tpu.matmul %199, %4, %cst_115 {dimension_numbers = #tpu.dot_dimension_numbers<[1], [0], [0], [1], [0, 0, 1, 1], [], []>} : vector<16x32xf32>, vector<32x32xf32>, vector<16x32xf32> -> vector<16x32xf32>
    %201 = arith.addf %198, %200 : vector<16x32xf32>
    %202 = math.tanh %201 : vector<16x32xf32>
    %203 = arith.mulf %197, %163 : vector<16x32xf32>
    %cst_116 = arith.constant 1.000000e+00 : f32
    %204 = vector.broadcast %cst_116 : f32 to vector<16x32xf32>
    %205 = arith.subf %204, %197 : vector<16x32xf32>
    %206 = arith.mulf %205, %202 : vector<16x32xf32>
    %207 = arith.addf %203, %206 : vector<16x32xf32>
    %cst_117 = arith.constant dense<0.000000e+00> : vector<16x3xf32>
    %208 = tpu.matmul %207, %5, %cst_117 {dimension_numbers = #tpu.dot_dimension_numbers<[1], [0], [0], [1], [0, 0, 1, 1], [], []>} : vector<16x32xf32>, vector<32x3xf32>, vector<16x3xf32> -> vector<16x3xf32>
    %209 = arith.addf %208, %11 : vector<16x3xf32>
    %210 = arith.index_cast %c2_i32 : i32 to index
    %c0_118 = arith.constant 0 : index
    %c0_119 = arith.constant 0 : index
    %211 = vector.load %arg9[%210, %c0_118, %c0_119] : memref<6x16x3xf32, #tpu.memory_space<vmem>>, vector<1x16x3xf32>
    %212 = vector.shape_cast %211 : vector<1x16x3xf32> to vector<16x3xf32>
    %213 = vector.shape_cast %209 : vector<16x3xf32> to vector<1x16x3xf32>
    tpu.vector_store %arg9[%210, %c0_118, %c0_119], %213 {strides = array<i32>} : memref<6x16x3xf32, #tpu.memory_space<vmem>>, vector<1x16x3xf32>,
    %c3_i32 = arith.constant 3 : i32
    %c1_i32_120 = arith.constant 1 : i32
    %214 = arith.subi %c3_i32, %c1_i32_120 : i32
    %215 = arith.index_cast %214 : i32 to index
    %c0_121 = arith.constant 0 : index
    %c0_122 = arith.constant 0 : index
    %216 = vector.load %arg0[%215, %c0_121, %c0_122] : memref<6x16x11xf32, #tpu.memory_space<vmem>>, vector<1x16x11xf32>
    %217 = vector.shape_cast %216 : vector<1x16x11xf32> to vector<16x11xf32>
    %218 = vector.extract_strided_slice %217 {offsets = [0, 3], sizes = [16, 3], strides = [1, 1]} : vector<16x11xf32> to vector<16x3xf32>
    %219 = arith.subf %209, %218 : vector<16x3xf32>
    %220 = arith.index_cast %c3_i32 : i32 to index
    %c0_123 = arith.constant 0 : index
    %c0_124 = arith.constant 0 : index
    %221 = vector.load %arg11[%220, %c0_123, %c0_124] : memref<6x16x1xf32, #tpu.memory_space<vmem>>, vector<1x16x1xf32>
    %222 = vector.shape_cast %221 : vector<1x16x1xf32> to vector<16x1xf32>
    %223 = vector.broadcast %222 : vector<16x1xf32> to vector<16x3xf32>
    %224 = arith.mulf %219, %223 : vector<16x3xf32>
    %225 = arith.index_cast %c3_i32 : i32 to index
    %c0_125 = arith.constant 0 : index
    %c0_126 = arith.constant 0 : index
    %226 = vector.load %arg10[%225, %c0_125, %c0_126] : memref<6x16x96xf32, #tpu.memory_space<vmem>>, vector<1x16x96xf32>
    %227 = vector.shape_cast %226 : vector<1x16x96xf32> to vector<16x96xf32>
    %cst_127 = arith.constant dense<0.000000e+00> : vector<16x96xf32>
    %228 = tpu.matmul %209, %1, %cst_127 {dimension_numbers = #tpu.dot_dimension_numbers<[1], [0], [0], [1], [0, 0, 1, 1], [], []>} : vector<16x3xf32>, vector<3x96xf32>, vector<16x96xf32> -> vector<16x96xf32>
    %229 = arith.addf %227, %228 : vector<16x96xf32>
    %cst_128 = arith.constant dense<0.000000e+00> : vector<16x96xf32>
    %230 = tpu.matmul %224, %2, %cst_128 {dimension_numbers = #tpu.dot_dimension_numbers<[1], [0], [0], [1], [0, 0, 1, 1], [], []>} : vector<16x3xf32>, vector<3x96xf32>, vector<16x96xf32> -> vector<16x96xf32>
    %231 = arith.addf %229, %230 : vector<16x96xf32>
    %232 = vector.extract_strided_slice %231 {offsets = [0, 0], sizes = [16, 64], strides = [1, 1]} : vector<16x96xf32> to vector<16x64xf32>
    %cst_129 = arith.constant dense<0.000000e+00> : vector<16x64xf32>
    %233 = tpu.matmul %207, %3, %cst_129 {dimension_numbers = #tpu.dot_dimension_numbers<[1], [0], [0], [1], [0, 0, 1, 1], [], []>} : vector<16x32xf32>, vector<32x64xf32>, vector<16x64xf32> -> vector<16x64xf32>
    %234 = arith.addf %232, %233 : vector<16x64xf32>
    %235 = arith.negf %234 : vector<16x64xf32>
    %236 = math.exp %235 : vector<16x64xf32>
    %cst_130 = arith.constant 1.000000e+00 : f32
    %237 = vector.broadcast %cst_130 : f32 to vector<16x64xf32>
    %238 = arith.addf %237, %236 : vector<16x64xf32>
    %239 = arith.divf %237, %238 : vector<16x64xf32>
    %240 = vector.extract_strided_slice %239 {offsets = [0, 0], sizes = [16, 32], strides = [1, 1]} : vector<16x64xf32> to vector<16x32xf32>
    %241 = vector.extract_strided_slice %239 {offsets = [0, 32], sizes = [16, 32], strides = [1, 1]} : vector<16x64xf32> to vector<16x32xf32>
    %242 = vector.extract_strided_slice %231 {offsets = [0, 64], sizes = [16, 32], strides = [1, 1]} : vector<16x96xf32> to vector<16x32xf32>
    %243 = arith.mulf %207, %240 : vector<16x32xf32>
    %cst_131 = arith.constant dense<0.000000e+00> : vector<16x32xf32>
    %244 = tpu.matmul %243, %4, %cst_131 {dimension_numbers = #tpu.dot_dimension_numbers<[1], [0], [0], [1], [0, 0, 1, 1], [], []>} : vector<16x32xf32>, vector<32x32xf32>, vector<16x32xf32> -> vector<16x32xf32>
    %245 = arith.addf %242, %244 : vector<16x32xf32>
    %246 = math.tanh %245 : vector<16x32xf32>
    %247 = arith.mulf %241, %207 : vector<16x32xf32>
    %cst_132 = arith.constant 1.000000e+00 : f32
    %248 = vector.broadcast %cst_132 : f32 to vector<16x32xf32>
    %249 = arith.subf %248, %241 : vector<16x32xf32>
    %250 = arith.mulf %249, %246 : vector<16x32xf32>
    %251 = arith.addf %247, %250 : vector<16x32xf32>
    %cst_133 = arith.constant dense<0.000000e+00> : vector<16x3xf32>
    %252 = tpu.matmul %251, %5, %cst_133 {dimension_numbers = #tpu.dot_dimension_numbers<[1], [0], [0], [1], [0, 0, 1, 1], [], []>} : vector<16x32xf32>, vector<32x3xf32>, vector<16x3xf32> -> vector<16x3xf32>
    %253 = arith.addf %252, %11 : vector<16x3xf32>
    %254 = arith.index_cast %c3_i32 : i32 to index
    %c0_134 = arith.constant 0 : index
    %c0_135 = arith.constant 0 : index
    %255 = vector.load %arg9[%254, %c0_134, %c0_135] : memref<6x16x3xf32, #tpu.memory_space<vmem>>, vector<1x16x3xf32>
    %256 = vector.shape_cast %255 : vector<1x16x3xf32> to vector<16x3xf32>
    %257 = vector.shape_cast %253 : vector<16x3xf32> to vector<1x16x3xf32>
    tpu.vector_store %arg9[%254, %c0_134, %c0_135], %257 {strides = array<i32>} : memref<6x16x3xf32, #tpu.memory_space<vmem>>, vector<1x16x3xf32>,
    %c4_i32 = arith.constant 4 : i32
    %c1_i32_136 = arith.constant 1 : i32
    %258 = arith.subi %c4_i32, %c1_i32_136 : i32
    %259 = arith.index_cast %258 : i32 to index
    %c0_137 = arith.constant 0 : index
    %c0_138 = arith.constant 0 : index
    %260 = vector.load %arg0[%259, %c0_137, %c0_138] : memref<6x16x11xf32, #tpu.memory_space<vmem>>, vector<1x16x11xf32>
    %261 = vector.shape_cast %260 : vector<1x16x11xf32> to vector<16x11xf32>
    %262 = vector.extract_strided_slice %261 {offsets = [0, 3], sizes = [16, 3], strides = [1, 1]} : vector<16x11xf32> to vector<16x3xf32>
    %263 = arith.subf %253, %262 : vector<16x3xf32>
    %264 = arith.index_cast %c4_i32 : i32 to index
    %c0_139 = arith.constant 0 : index
    %c0_140 = arith.constant 0 : index
    %265 = vector.load %arg11[%264, %c0_139, %c0_140] : memref<6x16x1xf32, #tpu.memory_space<vmem>>, vector<1x16x1xf32>
    %266 = vector.shape_cast %265 : vector<1x16x1xf32> to vector<16x1xf32>
    %267 = vector.broadcast %266 : vector<16x1xf32> to vector<16x3xf32>
    %268 = arith.mulf %263, %267 : vector<16x3xf32>
    %269 = arith.index_cast %c4_i32 : i32 to index
    %c0_141 = arith.constant 0 : index
    %c0_142 = arith.constant 0 : index
    %270 = vector.load %arg10[%269, %c0_141, %c0_142] : memref<6x16x96xf32, #tpu.memory_space<vmem>>, vector<1x16x96xf32>
    %271 = vector.shape_cast %270 : vector<1x16x96xf32> to vector<16x96xf32>
    %cst_143 = arith.constant dense<0.000000e+00> : vector<16x96xf32>
    %272 = tpu.matmul %253, %1, %cst_143 {dimension_numbers = #tpu.dot_dimension_numbers<[1], [0], [0], [1], [0, 0, 1, 1], [], []>} : vector<16x3xf32>, vector<3x96xf32>, vector<16x96xf32> -> vector<16x96xf32>
    %273 = arith.addf %271, %272 : vector<16x96xf32>
    %cst_144 = arith.constant dense<0.000000e+00> : vector<16x96xf32>
    %274 = tpu.matmul %268, %2, %cst_144 {dimension_numbers = #tpu.dot_dimension_numbers<[1], [0], [0], [1], [0, 0, 1, 1], [], []>} : vector<16x3xf32>, vector<3x96xf32>, vector<16x96xf32> -> vector<16x96xf32>
    %275 = arith.addf %273, %274 : vector<16x96xf32>
    %276 = vector.extract_strided_slice %275 {offsets = [0, 0], sizes = [16, 64], strides = [1, 1]} : vector<16x96xf32> to vector<16x64xf32>
    %cst_145 = arith.constant dense<0.000000e+00> : vector<16x64xf32>
    %277 = tpu.matmul %251, %3, %cst_145 {dimension_numbers = #tpu.dot_dimension_numbers<[1], [0], [0], [1], [0, 0, 1, 1], [], []>} : vector<16x32xf32>, vector<32x64xf32>, vector<16x64xf32> -> vector<16x64xf32>
    %278 = arith.addf %276, %277 : vector<16x64xf32>
    %279 = arith.negf %278 : vector<16x64xf32>
    %280 = math.exp %279 : vector<16x64xf32>
    %cst_146 = arith.constant 1.000000e+00 : f32
    %281 = vector.broadcast %cst_146 : f32 to vector<16x64xf32>
    %282 = arith.addf %281, %280 : vector<16x64xf32>
    %283 = arith.divf %281, %282 : vector<16x64xf32>
    %284 = vector.extract_strided_slice %283 {offsets = [0, 0], sizes = [16, 32], strides = [1, 1]} : vector<16x64xf32> to vector<16x32xf32>
    %285 = vector.extract_strided_slice %283 {offsets = [0, 32], sizes = [16, 32], strides = [1, 1]} : vector<16x64xf32> to vector<16x32xf32>
    %286 = vector.extract_strided_slice %275 {offsets = [0, 64], sizes = [16, 32], strides = [1, 1]} : vector<16x96xf32> to vector<16x32xf32>
    %287 = arith.mulf %251, %284 : vector<16x32xf32>
    %cst_147 = arith.constant dense<0.000000e+00> : vector<16x32xf32>
    %288 = tpu.matmul %287, %4, %cst_147 {dimension_numbers = #tpu.dot_dimension_numbers<[1], [0], [0], [1], [0, 0, 1, 1], [], []>} : vector<16x32xf32>, vector<32x32xf32>, vector<16x32xf32> -> vector<16x32xf32>
    %289 = arith.addf %286, %288 : vector<16x32xf32>
    %290 = math.tanh %289 : vector<16x32xf32>
    %291 = arith.mulf %285, %251 : vector<16x32xf32>
    %cst_148 = arith.constant 1.000000e+00 : f32
    %292 = vector.broadcast %cst_148 : f32 to vector<16x32xf32>
    %293 = arith.subf %292, %285 : vector<16x32xf32>
    %294 = arith.mulf %293, %290 : vector<16x32xf32>
    %295 = arith.addf %291, %294 : vector<16x32xf32>
    %cst_149 = arith.constant dense<0.000000e+00> : vector<16x3xf32>
    %296 = tpu.matmul %295, %5, %cst_149 {dimension_numbers = #tpu.dot_dimension_numbers<[1], [0], [0], [1], [0, 0, 1, 1], [], []>} : vector<16x32xf32>, vector<32x3xf32>, vector<16x3xf32> -> vector<16x3xf32>
    %297 = arith.addf %296, %11 : vector<16x3xf32>
    %298 = arith.index_cast %c4_i32 : i32 to index
    %c0_150 = arith.constant 0 : index
    %c0_151 = arith.constant 0 : index
    %299 = vector.load %arg9[%298, %c0_150, %c0_151] : memref<6x16x3xf32, #tpu.memory_space<vmem>>, vector<1x16x3xf32>
    %300 = vector.shape_cast %299 : vector<1x16x3xf32> to vector<16x3xf32>
    %301 = vector.shape_cast %297 : vector<16x3xf32> to vector<1x16x3xf32>
    tpu.vector_store %arg9[%298, %c0_150, %c0_151], %301 {strides = array<i32>} : memref<6x16x3xf32, #tpu.memory_space<vmem>>, vector<1x16x3xf32>,
    %c5_i32 = arith.constant 5 : i32
    %c1_i32_152 = arith.constant 1 : i32
    %302 = arith.subi %c5_i32, %c1_i32_152 : i32
    %303 = arith.index_cast %302 : i32 to index
    %c0_153 = arith.constant 0 : index
    %c0_154 = arith.constant 0 : index
    %304 = vector.load %arg0[%303, %c0_153, %c0_154] : memref<6x16x11xf32, #tpu.memory_space<vmem>>, vector<1x16x11xf32>
    %305 = vector.shape_cast %304 : vector<1x16x11xf32> to vector<16x11xf32>
    %306 = vector.extract_strided_slice %305 {offsets = [0, 3], sizes = [16, 3], strides = [1, 1]} : vector<16x11xf32> to vector<16x3xf32>
    %307 = arith.subf %297, %306 : vector<16x3xf32>
    %308 = arith.index_cast %c5_i32 : i32 to index
    %c0_155 = arith.constant 0 : index
    %c0_156 = arith.constant 0 : index
    %309 = vector.load %arg11[%308, %c0_155, %c0_156] : memref<6x16x1xf32, #tpu.memory_space<vmem>>, vector<1x16x1xf32>
    %310 = vector.shape_cast %309 : vector<1x16x1xf32> to vector<16x1xf32>
    %311 = vector.broadcast %310 : vector<16x1xf32> to vector<16x3xf32>
    %312 = arith.mulf %307, %311 : vector<16x3xf32>
    %313 = arith.index_cast %c5_i32 : i32 to index
    %c0_157 = arith.constant 0 : index
    %c0_158 = arith.constant 0 : index
    %314 = vector.load %arg10[%313, %c0_157, %c0_158] : memref<6x16x96xf32, #tpu.memory_space<vmem>>, vector<1x16x96xf32>
    %315 = vector.shape_cast %314 : vector<1x16x96xf32> to vector<16x96xf32>
    %cst_159 = arith.constant dense<0.000000e+00> : vector<16x96xf32>
    %316 = tpu.matmul %297, %1, %cst_159 {dimension_numbers = #tpu.dot_dimension_numbers<[1], [0], [0], [1], [0, 0, 1, 1], [], []>} : vector<16x3xf32>, vector<3x96xf32>, vector<16x96xf32> -> vector<16x96xf32>
    %317 = arith.addf %315, %316 : vector<16x96xf32>
    %cst_160 = arith.constant dense<0.000000e+00> : vector<16x96xf32>
    %318 = tpu.matmul %312, %2, %cst_160 {dimension_numbers = #tpu.dot_dimension_numbers<[1], [0], [0], [1], [0, 0, 1, 1], [], []>} : vector<16x3xf32>, vector<3x96xf32>, vector<16x96xf32> -> vector<16x96xf32>
    %319 = arith.addf %317, %318 : vector<16x96xf32>
    %320 = vector.extract_strided_slice %319 {offsets = [0, 0], sizes = [16, 64], strides = [1, 1]} : vector<16x96xf32> to vector<16x64xf32>
    %cst_161 = arith.constant dense<0.000000e+00> : vector<16x64xf32>
    %321 = tpu.matmul %295, %3, %cst_161 {dimension_numbers = #tpu.dot_dimension_numbers<[1], [0], [0], [1], [0, 0, 1, 1], [], []>} : vector<16x32xf32>, vector<32x64xf32>, vector<16x64xf32> -> vector<16x64xf32>
    %322 = arith.addf %320, %321 : vector<16x64xf32>
    %323 = arith.negf %322 : vector<16x64xf32>
    %324 = math.exp %323 : vector<16x64xf32>
    %cst_162 = arith.constant 1.000000e+00 : f32
    %325 = vector.broadcast %cst_162 : f32 to vector<16x64xf32>
    %326 = arith.addf %325, %324 : vector<16x64xf32>
    %327 = arith.divf %325, %326 : vector<16x64xf32>
    %328 = vector.extract_strided_slice %327 {offsets = [0, 0], sizes = [16, 32], strides = [1, 1]} : vector<16x64xf32> to vector<16x32xf32>
    %329 = vector.extract_strided_slice %327 {offsets = [0, 32], sizes = [16, 32], strides = [1, 1]} : vector<16x64xf32> to vector<16x32xf32>
    %330 = vector.extract_strided_slice %319 {offsets = [0, 64], sizes = [16, 32], strides = [1, 1]} : vector<16x96xf32> to vector<16x32xf32>
    %331 = arith.mulf %295, %328 : vector<16x32xf32>
    %cst_163 = arith.constant dense<0.000000e+00> : vector<16x32xf32>
    %332 = tpu.matmul %331, %4, %cst_163 {dimension_numbers = #tpu.dot_dimension_numbers<[1], [0], [0], [1], [0, 0, 1, 1], [], []>} : vector<16x32xf32>, vector<32x32xf32>, vector<16x32xf32> -> vector<16x32xf32>
    %333 = arith.addf %330, %332 : vector<16x32xf32>
    %334 = math.tanh %333 : vector<16x32xf32>
    %335 = arith.mulf %329, %295 : vector<16x32xf32>
    %cst_164 = arith.constant 1.000000e+00 : f32
    %336 = vector.broadcast %cst_164 : f32 to vector<16x32xf32>
    %337 = arith.subf %336, %329 : vector<16x32xf32>
    %338 = arith.mulf %337, %334 : vector<16x32xf32>
    %339 = arith.addf %335, %338 : vector<16x32xf32>
    %cst_165 = arith.constant dense<0.000000e+00> : vector<16x3xf32>
    %340 = tpu.matmul %339, %5, %cst_165 {dimension_numbers = #tpu.dot_dimension_numbers<[1], [0], [0], [1], [0, 0, 1, 1], [], []>} : vector<16x32xf32>, vector<32x3xf32>, vector<16x3xf32> -> vector<16x3xf32>
    %341 = arith.addf %340, %11 : vector<16x3xf32>
    %342 = arith.index_cast %c5_i32 : i32 to index
    %c0_166 = arith.constant 0 : index
    %c0_167 = arith.constant 0 : index
    %343 = vector.load %arg9[%342, %c0_166, %c0_167] : memref<6x16x3xf32, #tpu.memory_space<vmem>>, vector<1x16x3xf32>
    %344 = vector.shape_cast %343 : vector<1x16x3xf32> to vector<16x3xf32>
    %345 = vector.shape_cast %341 : vector<16x3xf32> to vector<1x16x3xf32>
    tpu.vector_store %arg9[%342, %c0_166, %c0_167], %345 {strides = array<i32>} : memref<6x16x3xf32, #tpu.memory_space<vmem>>, vector<1x16x3xf32>,
    %c5_i32_168 = arith.constant 5 : i32
    return
  }
}

</mosaic_0001>

<bundles_post_ra>
// kernel: tpu_custom_call.1
= control target key start
LH: loop header
LB: loop body
LE: loop exit
PB: predicated region body
PF: predicated region fallthrough
CT: control target
= control target key end

     0   :  { %vm65_vm0 = vcmask 1042432   ;;  %s2284_s15 = smov 125   ;;  %vm58_vm1 = vcmask 89088   ;;  %s2285_s25 = smov 120   ;;  %v2286_v16 = vmov 0.0   ;;  %vm496_vm2 = vcmask 23552   ;;  %s3102_s0 = inlined_call_operand.vmem [shape: f32[6,16,11], index: 0, kind: input, shape index: {}]   ;;  %s3103_s1 = inlined_call_operand.vmem [shape: f32[11,96], index: 1, kind: input, shape index: {}]   ;;  %s3104_s2 = inlined_call_operand.vmem [shape: f32[3,96], index: 2, kind: input, shape index: {}]   ;;  %s3105_s3 = inlined_call_operand.vmem [shape: f32[3,96], index: 3, kind: input, shape index: {}]   ;;  %s3106_s6 = inlined_call_operand.vmem [shape: f32[1,96], index: 6, kind: input, shape index: {}]   ;;  %s3107_s4 = inlined_call_operand.vmem [shape: f32[32,64], index: 4, kind: input, shape index: {}]   ;;  %s3108_s5 = inlined_call_operand.vmem [shape: f32[32,32], index: 5, kind: input, shape index: {}]   ;;  %s3109_s7 = inlined_call_operand.vmem [shape: f32[32,3], index: 7, kind: input, shape index: {}]   ;;  %s3110_s8 = inlined_call_operand.vmem [shape: f32[1,3], index: 8, kind: input, shape index: {}]   ;;  %s3111_s9 = inlined_call_operand.vmem [shape: f32[6,16,3], index: 9, kind: output, shape index: {}]  }
   0x1   :  { %v2345_v0 = vld [vmem:[%s3102_s0] sm:$0xff]  ;;  %v2350_v1 = vld [vmem:[%s3102_s0 + $0x8] sm:$0xff]  ;;  %v2041_v6 = vld [vmem:[%s3102_s0 + $0x30] sm:$0xff]  ;;  %vm92_vm3 = vcmask 785408   ;;  %vm565_vm8 = vcmask 261120   ;;  %s2287_s18 = smov 64  }
   0x2   :  { %v33_v2 = vld [vmem:[%s3103_s1 + $0x8] sm:$0x7]  ;;  %492 = vrot.lane.b32.xlu0 %v2345_v0, %s2284_s15  ;;  %494 = vrot.lane.b32.xlu1 %v2350_v1, %s2284_s15  ;;  %v32_v3 = vld [vmem:[%s3103_s1] sm:$0xff]  ;;  %s2288_s19 = smov 96   ;;  %s2289_s20 = smov 122  }
   0x3   :  { %2028 = vmatpush.msk.msra.mxu0 %vm65_vm0, %v33_v2  ;;  %2038 = vmatpush.msk.msra.mxu2 %vm65_vm0, %v33_v2  ;;  %v2367_v4 = vld [vmem:[%s3102_s0 + $0x20] sm:$0xff]  ;;  %v2397_v8 = vld [vmem:[%s3102_s0 + $0x28] sm:$0xff]  ;;  %v2042_v9 = vld [vmem:[%s3102_s0 + $0x38] sm:$0xff]  ;;  %s2291_s12 = smov 32  }
   0x4   :  { %2043 = vmatpush.msk.msra.mxu3 %vm65_vm0, %v33_v2  ;;  %v2373_v5 = vld [vmem:[%s3104_s2] sm:$0x7]  ;;  %2033 = vmatpush.msk.msra.mxu1 %vm65_vm0, %v33_v2  ;;  %v2419_v11 = vld [vmem:[%s3107_s4 + $0x18] sm:$0xff]  ;;  %v2424_v12 = vld [vmem:[%s3107_s4 + $0x10] sm:$0xff] }
   0x5   :  { %84 = vmatpush.msra.mxu0 %v32_v3  ;;  %198 = vmatpush.msra.mxu2 %v32_v3  ;;  %v2389_v7 = vld [vmem:[%s3105_s3] sm:$0x7]  ;;  %v2047_v13 = vld [vmem:[%s3102_s0 + $0x48] sm:$0xff]  ;;  %v2476_v38 = vld [vmem:[%s3102_s0 + $0x10] sm:$0xff] }
   0x6   :  { %2029 = vmatmul.msk.f32.vlgmr.msra.gmra.mxu0 %vm58_vm1, %v2345_v0  ;;  %2039 = vmatmul.msk.f32.vlgmr.msra.gmra.mxu2 %vm58_vm1, %v2367_v4  ;;  %v2046_v10 = vld [vmem:[%s3102_s0 + $0x40] sm:$0xff]  ;;  %v2435_v14 = vld [vmem:[%s3107_s4 + $0x8] sm:$0xff]  ;;  %v2483_v39 = vld [vmem:[%s3102_s0 + $0x18] sm:$0xff] }
   0x7   :  { %2048 = vmatpush.msk.msrb.mxu0 %vm65_vm0, %v33_v2  ;;  %2056 = vmatpush.msk.msrb.mxu2 %vm65_vm0, %v2373_v5  ;;  %v2440_v15 = vld [vmem:[%s3107_s4] sm:$0xff]  ;;  %v2051_v40 = vld [vmem:[%s3102_s0 + $0x50] sm:$0xff]  ;;  %v2052_v42 = vld [vmem:[%s3102_s0 + $0x58] sm:$0xff] }
   0x8   :  { %276 = vmatpush.msra.mxu3 %v32_v3  ;;  %119 = vmatpush.msra.mxu1 %v32_v3  ;;  %v2454_v20 = vld [vmem:[%s3106_s6] ss:$0 sm:$0xff]  ;;  %v2497_v43 = vld [vmem:[%s3108_s5 + $0x18] sm:$0xff]  ;;  %v2504_v44 = vld [vmem:[%s3108_s5 + $0x10] sm:$0xff] }
   0x9   :  { %2044 = vmatmul.msk.f32.vlgmr.msra.gmra.mxu3 %vm58_vm1, %v2041_v6  ;;  %354 = vmatpush.msrb.mxu0 %v32_v3  ;;  %v2510_v48 = vld [vmem:[%s3108_s5 + $0x8] sm:$0xff]  ;;  %v2515_v49 = vld [vmem:[%s3108_s5] sm:$0xff] }
   0xa   :  { %529 = vrot.lane.b32.xlu0 %v2345_v0, %s2285_s25  ;;  %531 = vrot.lane.b32.xlu1 %v2350_v1, %s2285_s25 }
   0xb   :  { %2059 = vmatpush.msk.msrb.mxu3 %vm65_vm0, %v2389_v7  ;;  %2053 = vmatpush.msk.msrb.mxu1 %vm65_vm0, %v33_v2 }
   0xc   :  { %581 = vmatpush.msra.mxu0 %v2419_v11  ;;  %2034 = vmatmul.msk.f32.vlgmr.msra.gmra.mxu1 %vm58_vm1, %v2476_v38 }
   0xd   :  { %2068 = vmatpush.msk.msra.mxu3 %vm65_vm0, %v2373_v5  ;;  %432 = vmatpush.msrb.mxu1 %v32_v3 }
   0xe   :  { %2030 = vmatmul.msk.f32.gmra.mxu0 %vm58_vm1, %v2350_v1  ;;  %2040 = vmatmul.msk.f32.gmra.mxu2 %vm58_vm1, %v2397_v8 }
   0xf   :  { %582 = vmatpush.msra.mxu0 %v2424_v12  ;;  %652 = vmatpush.msra.mxu1 %v2497_v43 }
  0x11   :  { %2045 = vmatmul.msk.f32.gmra.mxu3 %vm58_vm1, %v2042_v9  ;;  %583 = vmatpush.msra.mxu0 %v2435_v14 }
  0x12   :  { %653 = vmatpush.msra.mxu1 %v2504_v44 }
  0x13   :  { %584 = vmatpush.msra.mxu0 %v2440_v15 }
  0x14   :  { %2035 = vmatmul.msk.f32.gmra.mxu1 %vm58_vm1, %v2483_v39 }
  0x15   :  { %654 = vmatpush.msra.mxu1 %v2510_v48 }
  0x16   :  { %2049 = vmatmul.msk.f32.vlgmr.msrb.gmra.mxu0 %vm58_vm1, %v2046_v10 }
  0x17   :  { %2071 = vmatpush.msk.msrb.mxu0 %vm65_vm0, %v2389_v7  ;;  %655 = vmatpush.msra.mxu1 %v2515_v49 }
  0x1c   :  { %2054 = vmatmul.msk.f32.vlgmr.msrb.gmra.mxu1 %vm58_vm1, %v2051_v40 }
  0x1d   :  { %826 = vmatpush.msrb.mxu1 %v2419_v11 }
  0x1e   :  { %2050 = vmatmul.msk.f32.gmra.mxu0 %vm58_vm1, %v2047_v13 }
  0x1f   :  { %827 = vmatpush.msrb.mxu1 %v2424_v12 }
  0x21   :  { %828 = vmatpush.msrb.mxu1 %v2435_v14 }
  0x23   :  { %829 = vmatpush.msrb.mxu1 %v2440_v15 }
  0x24   :  { %2055 = vmatmul.msk.f32.gmra.mxu1 %vm58_vm1, %v2052_v42 }
  0x26   :  { %585 = vmatmul.f32.vlgmr.msra.gmra.mxu0 %v2286_v16 }
  0x27   :  { %2086 = vmatpush.msk.msra.mxu0 %vm65_vm0, %v2373_v5 }
  0x2e   :  { %588 = vmatmul.f32.gmra.mxu0 %v2286_v16 }
  0x74   :  { %v493_v17 = vpop.permute.xlu0 %492  ;;  %v495_v18 = vpop.permute.xlu1 %494 }
  0x75   :  { %2057 = vmatmul.msk.f32.vlgmr.msrb.gmra.mxu2 %vm496_vm2, %v493_v17 }
  0x7c   :  { %v530_v19 = vpop.permute.xlu0 %529  ;;  %v532_v21 = vpop.permute.xlu1 %531 }
  0x7d   :  { %2058 = vmatmul.msk.f32.gmra.mxu2 %vm496_vm2, %v495_v18  ;;  %2060 = vmatmul.msk.f32.vlgmr.msrb.gmra.mxu3 %vm496_vm2, %v530_v19 }
  0x83   :  { %v86_v22 = vpop.f32.mrf.mxu0 }
  0x84   :  { %v87_v23 = vadd.f32 %v2454_v20, %v86_v22 }
  0x85   :  { %2061 = vmatmul.msk.f32.gmra.mxu3 %vm496_vm2, %v532_v21 }
  0x86   :  { %93 = vst.msk [vmem:[#allocation2] sm:$0xff] %vm92_vm3, %v87_v23 }
  0x89   :  { %v200_v24 = vpop.f32.mrf.mxu2 }
  0x8a   :  { %v201_v25 = vadd.f32 %v2454_v20, %v200_v24 }
  0x8b   :  { %v89_v26 = vpop.f32.mrf.mxu0 }
  0x8c   :  { %207 = vst.msk [vmem:[#allocation2 + $0x20] sm:$0xff] %vm92_vm3, %v201_v25  ;;  %v90_v27 = vadd.f32 %v2454_v20, %v89_v26  ;;  %v278_v28 = vpop.f32.mrf.mxu3 }
  0x8d   :  { %v279_v29 = vadd.f32 %v2454_v20, %v278_v28  ;;  %v488_v45 = vld [vmem:[#allocation2] sm:$0xff] }
  0x8e   :  { %94 = vst.msk [vmem:[#allocation2 + $0x8] sm:$0xff] %vm92_vm3, %v90_v27 }
  0x8f   :  { %285 = vst.msk [vmem:[#allocation2 + $0x30] sm:$0xff] %vm92_vm3, %v279_v29 }
  0x91   :  { %v203_v30 = vpop.f32.mrf.mxu2 }
  0x92   :  { %v204_v31 = vadd.f32 %v2454_v20, %v203_v30 }
  0x93   :  { %v356_v32 = vpop.f32.mrf.mxu0 }
  0x94   :  { %208 = vst.msk [vmem:[#allocation2 + $0x28] sm:$0xff] %vm92_vm3, %v204_v31  ;;  %v357_v33 = vadd.f32 %v2454_v20, %v356_v32  ;;  %v281_v34 = vpop.f32.mrf.mxu3 }
  0x95   :  { %v282_v35 = vadd.f32 %v2454_v20, %v281_v34  ;;  %v489_v55 = vld [vmem:[#allocation2 + $0x8] sm:$0xff] }
  0x96   :  { %363 = vst.msk [vmem:[#allocation2 + $0x40] sm:$0xff] %vm92_vm3, %v357_v33 }
  0x97   :  { %286 = vst.msk [vmem:[#allocation2 + $0x38] sm:$0xff] %vm92_vm3, %v282_v35  ;;  %v121_v35 = vpop.f32.mrf.mxu1 }
  0x9b   :  { %v359_v36 = vpop.f32.mrf.mxu0 }
  0x9c   :  { %v360_v37 = vadd.f32 %v2454_v20, %v359_v36  ;;  %v122_v36 = vadd.f32 %v2454_v20, %v121_v35 }
  0x9e   :  { %364 = vst.msk [vmem:[#allocation2 + $0x48] sm:$0xff] %vm92_vm3, %v360_v37 }
  0x9f   :  { %128 = vst.msk [vmem:[#allocation2 + $0x10] sm:$0xff] %vm92_vm3, %v122_v36  ;;  %v124_v37 = vpop.f32.mrf.mxu1 }
  0xa0   :  { %v125_v40 = vadd.f32 %v2454_v20, %v124_v37 }
  0xa2   :  { %129 = vst.msk [vmem:[#allocation2 + $0x18] sm:$0xff] %vm92_vm3, %v125_v40 }
  0xa3   :  { %v586_v46 = vpop.f32.mrf.mxu0 }
  0xab   :  { %v589_v58 = vpop.f32.mrf.mxu0 }
  0xf8   :  { %v521_v41 = vpop.f32.mrf.mxu2 }
  0xf9   :  { %v527_v47 = vadd.f32 %v521_v41, %v488_v45  ;;  %v434_v41 = vpop.f32.mrf.mxu1 }
  0xfa   :  { %v435_v42 = vadd.f32 %v2454_v20, %v434_v41 }
  0xfc   :  { %441 = vst.msk [vmem:[#allocation2 + $0x50] sm:$0xff] %vm92_vm3, %v435_v42 }
 0x100   :  { %v557_v50 = vpop.f32.mrf.mxu3  ;;  %v524_v53 = vpop.f32.mrf.mxu2 }
 0x101   :  { %v2518_v51 = vadd.f32 %v557_v50, %v527_v47  ;;  %v528_v56 = vadd.f32 %v524_v53, %v489_v55  ;;  %v437_v45 = vpop.f32.mrf.mxu1 }
 0x103   :  { %v592_v52 = vadd.f32 %v586_v46, %v2518_v51  ;;  %v438_v46 = vadd.f32 %v2454_v20, %v437_v45 }
 0x105   :  { %v2062_v54 = vmul.f32 -1.442695, %v592_v52  ;;  %442 = vst.msk [vmem:[#allocation2 + $0x58] sm:$0xff] %vm92_vm3, %v438_v46  ;;  %v130_v52 = vsub.f32 %v2476_v38, %v2345_v0  ;;  %v2628_v46 = vld [vmem:[%s3110_s8] ss:$0 sm:$0xff] }
 0x107   :  { %2169 = vpow2.f32 %v2062_v54  ;;  %vm137_vm13 = vweird.f32 %v130_v52 }
 0x108   :  { %v560_v57 = vpop.f32.mrf.mxu3 }
 0x109   :  { %v2525_v59 = vadd.f32 %v560_v57, %v528_v56 }
 0x10b   :  { %v593_v60 = vadd.f32 %v589_v58, %v2525_v59 }
 0x10d   :  { %v2170_v61 = vpop.eup %2169  ;;  %v2063_v62 = vmul.f32 -1.442695, %v593_v60 }
 0x10e   :  { %v600_v63 = vadd.f32 1.0, %v2170_v61 }
 0x10f   :  { %2171 = vpow2.f32 %v2063_v62  ;;  %v143_v62 = vand.u32 2147483648, %v130_v52 }
 0x110   :  { %2173 = vrcp.f32 %v600_v63  ;;  %v613_v13 = vand.u32 2147483648, %v600_v63  ;;  %v611_v17 = vand.u32 2147483647, %v600_v63  ;;  %vm607_vm5 = vweird.f32 %v600_v63 }
 0x112   :  { %v614_v21 = vor.u32 1.1754944e-38, %v613_v13  ;;  %vm612_vm7 = vcmp.eq.f32.partialorder %v611_v17, 8.507059e+37  ;;  %v2572_v13 = vld [vmem:[%s3109_s7 + $0x10] sm:$0xff]  ;;  %v2586_v17 = vld [vmem:[%s3109_s7] sm:$0xff] }
 0x115   :  { %v2172_v2 = vpop.eup %2171 }
 0x116   :  { %v2174_v3 = vpop.eup %2173  ;;  %v601_v6 = vadd.f32 1.0, %v2172_v2  ;;  %v141_v2 = vand.u32 2147483647, %v130_v52 }
 0x117   :  { %v603_v9 = vmul.f32 %v2174_v3, %v600_v63  ;;  %vm608_vm4 = vweird.f32 %v2174_v3 }
 0x118   :  { %2175 = vrcp.f32 %v601_v6  ;;  %vm609_vm6 = vmor %vm607_vm5, %vm608_vm4  ;;  %v628_v27 = vand.u32 2147483648, %v601_v6  ;;  %v626_v29 = vand.u32 2147483647, %v601_v6  ;;  %vm622_vm10 = vweird.f32 %v601_v6 }
 0x119   :  { %v604_v10 = vsub.f32 1.0, %v603_v9  ;;  %2177 = vrcp.f32 %v130_v52  ;;  %vm142_vm1 = vcmp.eq.f32.partialorder %v141_v2, 8.507059e+37 }
 0x11a   :  { %v629_v31 = vor.u32 1.1754944e-38, %v628_v27  ;;  %vm627_vm12 = vcmp.eq.f32.partialorder %v626_v29, 8.507059e+37 }
 0x11b   :  { %v605_v16 = vmul.f32 %v2174_v3, %v604_v10  ;;  %v2567_v10 = vld [vmem:[%s3109_s7 + $0x18] sm:$0xff] }
 0x11c   :  { %711 = vmatpush.msra.mxu2 %v2567_v10  ;;  %970 = vmatpush.msrb.mxu3 %v2567_v10 }
 0x11d   :  { %v606_v18 = vadd.f32 %v2174_v3, %v605_v16  ;;  %v2579_v16 = vld [vmem:[%s3109_s7 + $0x8] sm:$0xff] }
 0x11e   :  { %v2176_v19 = vpop.eup %2175  ;;  %712 = vmatpush.msra.mxu2 %v2572_v13  ;;  %971 = vmatpush.msrb.mxu3 %v2572_v13 }
 0x11f   :  { %v618_v22 = vmul.f32 %v2176_v19, %v601_v6  ;;  %v610_v23 = vsel %vm609_vm6, %v2174_v3, %v606_v18  ;;  %vm623_vm9 = vweird.f32 %v2176_v19  ;;  %v2178_v54 = vpop.eup %2177 }
 0x120   :  { %v2529_v24 = vsel %vm612_vm7, %v614_v21, %v610_v23  ;;  %vm624_vm11 = vmor %vm622_vm10, %vm623_vm9  ;;  %v133_v56 = vmul.f32 %v2178_v54, %v130_v52  ;;  %vm138_vm14 = vweird.f32 %v2178_v54  ;;  %713 = vmatpush.msra.mxu2 %v2579_v16  ;;  %972 = vmatpush.msrb.mxu3 %v2579_v16  ;;  %vm171_vm7 = vcmask 7168  }
 0x121   :  { %v2532_v25 = vmul.f32 0.0, %v2529_v24  ;;  %v619_v26 = vsub.f32 1.0, %v618_v22  ;;  %vm139_vm15 = vmor %vm137_vm13, %vm138_vm14  ;;  %v675_v22 = vsub.f32 1.0, %v2529_v24 }
 0x122   :  { %v134_v57 = vsub.f32 1.0, %v133_v56  ;;  %714 = vmatpush.msra.mxu2 %v2586_v17  ;;  %973 = vmatpush.msrb.mxu3 %v2586_v17 }
 0x123   :  { %2064 = vmatmul.msk.f32.vlgmr.msra.gmra.mxu1 %vm565_vm8, %v2532_v25  ;;  %v620_v28 = vmul.f32 %v2176_v19, %v619_v26 }
 0x124   :  { %2089 = vmatpush.msk.msra.mxu1 %vm65_vm0, %v2389_v7  ;;  %v135_v61 = vmul.f32 %v2178_v54, %v134_v57  ;;  %909 = vmatpush.msrb.mxu2 %v2497_v43 }
 0x125   :  { %v621_v30 = vadd.f32 %v2176_v19, %v620_v28 }
 0x126   :  { %v136_v63 = vadd.f32 %v2178_v54, %v135_v61  ;;  %910 = vmatpush.msrb.mxu2 %v2504_v44 }
 0x127   :  { %v625_v32 = vsel %vm624_vm11, %v2176_v19, %v621_v30 }
 0x128   :  { %v2538_v33 = vsel %vm627_vm12, %v629_v31, %v625_v32  ;;  %v140_v6 = vsel %vm139_vm15, %v2178_v54, %v136_v63  ;;  %911 = vmatpush.msrb.mxu2 %v2510_v48 }
 0x129   :  { %v2541_v34 = vmul.f32 0.0, %v2538_v33  ;;  %v676_v35 = vsub.f32 1.0, %v2538_v33  ;;  %v2290_v33 = vmov 0  }
 0x12a   :  { %912 = vmatpush.msrb.mxu2 %v2515_v49  ;;  %2164 = vset.pattern.permute.xlu1 %v2290_v33 }
 0x12b   :  { %2065 = vmatmul.msk.f32.gmra.mxu1 %vm565_vm8, %v2541_v34  ;;  %2165 = vset.pattern.permute.xlu0 %v2290_v33 }
 0x12c   :  { %2166 = vset.pattern.permute.xlu2 %v2290_v33 }
 0x1a0   :  { %v657_v47 = vpop.f32.mrf.mxu1 }
 0x1a1   :  { %665 = vrot.lane.b32.xlu2 %v657_v47, %s2287_s18 }
 0x1a8   :  { %v660_v50 = vpop.f32.mrf.mxu1 }
 0x1a9   :  { %667 = vrot.lane.b32.xlu2 %v660_v50, %s2287_s18 }
 0x1fb   :  { %v666_v53 = vpop.permute.xlu2 %665 }
 0x1fc   :  { %v671_v55 = vadd.f32 %v666_v53, %v2518_v51  ;;  %v144_v51 = vor.u32 1.1754944e-38, %v143_v62  ;;  %v750_v62 = vld [vmem:[#allocation2 + $0x10] sm:$0xff] }
 0x1fe   :  { %2179 = vtanh.f32 %v671_v55  ;;  %v145_v9 = vsel %vm142_vm1, %v144_v51, %v140_v6 }
 0x203   :  { %v668_v20 = vpop.permute.xlu2 %667 }
 0x204   :  { %v2180_v58 = vpop.eup %2179  ;;  %v672_v60 = vadd.f32 %v668_v20, %v2525_v59  ;;  %v131_v59 = vsub.f32 %v2483_v39, %v2350_v1 }
 0x205   :  { %679 = vrot.lane.b32.xlu0 %v2180_v58, %s2288_s19 }
 0x206   :  { %2181 = vtanh.f32 %v672_v60  ;;  %vm152_vm3 = vweird.f32 %v131_v59  ;;  %v158_v28 = vand.u32 2147483648, %v131_v59  ;;  %v156_v31 = vand.u32 2147483647, %v131_v59 }
 0x207   :  { %2183 = vrcp.f32 %v131_v59 }
 0x208   :  { %v159_v32 = vor.u32 1.1754944e-38, %v158_v28  ;;  %vm157_vm6 = vcmp.eq.f32.partialorder %v156_v31, 8.507059e+37  ;;  %v751_v31 = vld [vmem:[#allocation2 + $0x18] sm:$0xff] }
 0x20c   :  { %v2182_v3 = vpop.eup %2181 }
 0x20d   :  { %681 = vrot.lane.b32.xlu1 %v2182_v3, %s2288_s19  ;;  %v2184_v18 = vpop.eup %2183 }
 0x20e   :  { %v148_v19 = vmul.f32 %v2184_v18, %v131_v59  ;;  %vm153_vm4 = vweird.f32 %v2184_v18 }
 0x20f   :  { %vm154_vm5 = vmor %vm152_vm3, %vm153_vm4 }
 0x210   :  { %v149_v21 = vsub.f32 1.0, %v148_v19 }
 0x212   :  { %v150_v23 = vmul.f32 %v2184_v18, %v149_v21 }
 0x214   :  { %v151_v30 = vadd.f32 %v2184_v18, %v150_v23 }
 0x215   :  { %164 = vrot.lane.b32.xlu1 %v145_v9, %s2289_s20 }
 0x216   :  { %v155_v36 = vsel %vm154_vm5, %v2184_v18, %v151_v30 }
 0x217   :  { %v160_v40 = vsel %vm157_vm6, %v159_v32, %v155_v36 }
 0x277   :  { %v680_v26 = vpop.permute.xlu0 %679 }
 0x278   :  { %v685_v27 = vmul.f32 %v680_v26, %v675_v22 }
 0x27a   :  { %v2598_v29 = vadd.f32 %v685_v27, %v2532_v25 }
 0x27c   :  { %691 = vrot.lane.b32.xlu2 %v2598_v29, %s2288_s19 }
 0x27f   :  { %v682_v24 = vpop.permute.xlu1 %681 }
 0x280   :  { %v686_v37 = vmul.f32 %v682_v24, %v676_v35 }
 0x282   :  { %v2604_v41 = vadd.f32 %v686_v37, %v2541_v34 }
 0x284   :  { %693 = vrot.lane.b32.xlu0 %v2604_v41, %s2288_s19  ;;  %166 = vrot.lane.b32.xlu2 %v160_v40, %s2289_s20 }
 0x287   :  { %v165_v25 = vpop.permute.xlu1 %164 }
 0x288   :  { %172 = vst.msk [vmem:[#allocation3 + $0x10] sm:$0xff] %vm171_vm7, %v165_v25 }
 0x28c   :  { %728 = vrot.lane.b32.xlu0 %v2345_v0, %s2284_s15  ;;  %730 = vrot.lane.b32.xlu2 %v2350_v1, %s2284_s15 }
 0x28f   :  { %v736_v34 = vld [vmem:[#allocation3 + $0x10] sm:$0xff] }
 0x290   :  { %740 = vperm.xlu1 %2164, %v736_v34  }
 0x2d6   :  { %v692_v42 = vpop.permute.xlu2 %691 }
 0x2d7   :  { %2066 = vmatmul.msk.f32.vlgmr.msra.gmra.mxu2 %vm565_vm8, %v692_v42  ;;  %2074 = vmatmul.msk.f32.vlgmr.msrb.gmra.mxu1 %vm565_vm8, %v692_v42 }
 0x2d8   :  { %1086 = vmatpush.msra.mxu2 %v2419_v11  ;;  %2104 = vmatpush.msk.msrb.mxu1 %vm65_vm0, %v2373_v5 }
 0x2da   :  { %1087 = vmatpush.msra.mxu2 %v2424_v12 }
 0x2dc   :  { %1088 = vmatpush.msra.mxu2 %v2435_v14 }
 0x2de   :  { %v167_v0 = vpop.permute.xlu2 %166  ;;  %1089 = vmatpush.msra.mxu2 %v2440_v15 }
 0x2df   :  { %173 = vst.msk [vmem:[#allocation3 + $0x18] sm:$0xff] %vm171_vm7, %v167_v0 }
 0x2e6   :  { %v737_v1 = vld [vmem:[#allocation3 + $0x18] sm:$0xff]  ;;  %v731_v20 = vpop.permute.xlu2 %730 }
 0x2e7   :  { %745 = vperm.xlu0 %2165, %v737_v1  }
 0x2f6   :  { %v694_v45 = vpop.permute.xlu0 %693 }
 0x2f7   :  { %2067 = vmatmul.msk.f32.gmra.mxu2 %vm565_vm8, %v694_v45  ;;  %2075 = vmatmul.msk.f32.gmra.mxu1 %vm565_vm8, %v694_v45 }
 0x2fe   :  { %v729_v50 = vpop.permute.xlu0 %728 }
 0x302   :  { %v741_v53 = vpop.permute.xlu1 %740 }
 0x354   :  { %v831_v6 = vpop.f32.mrf.mxu1 }
 0x359   :  { %v746_v58 = vpop.permute.xlu0 %745 }
 0x35a   :  { %v716_v47 = vpop.f32.mrf.mxu2 }
 0x35b   :  { %v717_v52 = vadd.f32 %v2628_v46, %v716_v47 }
 0x35d   :  { %722 = vst.msk [vmem:[%s3111_s9] sm:$0xff] %vm496_vm2, %v717_v52  ;;  %v734_v54 = vsub.f32 %v717_v52, %v729_v50  ;;  %2069 = vmatmul.msk.f32.vlgmr.msra.gmra.mxu3 %vm496_vm2, %v717_v52 }
 0x35e   :  { %1169 = vmatpush.msra.mxu3 %v2497_v43 }
 0x35f   :  { %v748_v55 = vmul.f32 %v741_v53, %v734_v54 }
 0x360   :  { %1170 = vmatpush.msra.mxu3 %v2504_v44 }
 0x361   :  { %2072 = vmatmul.msk.f32.vlgmr.msrb.gmra.mxu0 %vm496_vm2, %v748_v55 }
 0x362   :  { %1171 = vmatpush.msra.mxu3 %v2510_v48  ;;  %1230 = vmatpush.msrb.mxu0 %v2567_v10 }
 0x364   :  { %1172 = vmatpush.msra.mxu3 %v2515_v49  ;;  %1231 = vmatpush.msrb.mxu0 %v2572_v13 }
 0x366   :  { %1232 = vmatpush.msrb.mxu0 %v2579_v16 }
 0x368   :  { %1233 = vmatpush.msrb.mxu0 %v2586_v17 }
 0x374   :  { %v834_v33 = vpop.f32.mrf.mxu1 }
 0x37a   :  { %v719_v56 = vpop.f32.mrf.mxu2 }
 0x37b   :  { %v720_v57 = vadd.f32 %v2628_v46, %v719_v56 }
 0x37d   :  { %723 = vst.msk [vmem:[%s3111_s9 + $0x8] sm:$0xff] %vm496_vm2, %v720_v57  ;;  %v735_v60 = vsub.f32 %v720_v57, %v731_v20  ;;  %2070 = vmatmul.msk.f32.gmra.mxu3 %vm496_vm2, %v720_v57 }
 0x37f   :  { %v749_v61 = vmul.f32 %v746_v58, %v735_v60 }
 0x381   :  { %2073 = vmatmul.msk.f32.gmra.mxu0 %vm496_vm2, %v749_v61 }
 0x3de   :  { %v806_v3 = vpop.f32.mrf.mxu0 }
 0x3e0   :  { %v775_v63 = vpop.f32.mrf.mxu3 }
 0x3e1   :  { %v781_v2 = vadd.f32 %v775_v63, %v750_v62 }
 0x3e3   :  { %v2652_v51 = vadd.f32 %v806_v3, %v781_v2 }
 0x3e5   :  { %v837_v9 = vadd.f32 %v831_v6, %v2652_v51 }
 0x3e7   :  { %v2076_v59 = vmul.f32 -1.442695, %v837_v9  ;;  %v209_v9 = vsub.f32 %v2367_v4, %v2476_v38 }
 0x3e9   :  { %2185 = vpow2.f32 %v2076_v59  ;;  %vm216_vm3 = vweird.f32 %v209_v9  ;;  %v220_v4 = vand.u32 2147483647, %v209_v9 }
 0x3eb   :  { %vm221_vm6 = vcmp.eq.f32.partialorder %v220_v4, 8.507059e+37 }
 0x3ef   :  { %v2186_v18 = vpop.eup %2185 }
 0x3f0   :  { %v845_v19 = vadd.f32 1.0, %v2186_v18 }
 0x3f2   :  { %2187 = vrcp.f32 %v845_v19  ;;  %v858_v26 = vand.u32 2147483648, %v845_v19  ;;  %v856_v28 = vand.u32 2147483647, %v845_v19  ;;  %vm852_vm10 = vweird.f32 %v845_v19 }
 0x3f4   :  { %v859_v35 = vor.u32 1.1754944e-38, %v858_v26  ;;  %vm857_vm12 = vcmp.eq.f32.partialorder %v856_v28, 8.507059e+37  ;;  %v222_v28 = vand.u32 2147483648, %v209_v9 }
 0x3f8   :  { %v2188_v21 = vpop.eup %2187 }
 0x3f9   :  { %v848_v22 = vmul.f32 %v2188_v21, %v845_v19  ;;  %vm853_vm9 = vweird.f32 %v2188_v21 }
 0x3fa   :  { %vm854_vm11 = vmor %vm852_vm10, %vm853_vm9 }
 0x3fb   :  { %v849_v23 = vsub.f32 1.0, %v848_v22 }
 0x3fd   :  { %v850_v27 = vmul.f32 %v2188_v21, %v849_v23 }
 0x3fe   :  { %v809_v37 = vpop.f32.mrf.mxu0 }
 0x3ff   :  { %v851_v30 = vadd.f32 %v2188_v21, %v850_v27 }
 0x400   :  { %v778_v32 = vpop.f32.mrf.mxu3 }
 0x401   :  { %v782_v36 = vadd.f32 %v778_v32, %v751_v31  ;;  %v855_v24 = vsel %vm854_vm11, %v2188_v21, %v851_v30 }
 0x402   :  { %v2655_v40 = vsel %vm857_vm12, %v859_v35, %v855_v24 }
 0x403   :  { %v813_v25 = vadd.f32 %v809_v37, %v782_v36  ;;  %879 = vrot.lane.b32.xlu1 %v2655_v40, %s2291_s12  ;;  %v210_v36 = vsub.f32 %v2397_v8, %v2483_v39  ;;  %v934_v24 = vsub.f32 1.0, %v2655_v40 }
 0x405   :  { %v838_v34 = vadd.f32 %v834_v33, %v813_v25  ;;  %vm231_vm9 = vweird.f32 %v210_v36  ;;  %v235_v8 = vand.u32 2147483647, %v210_v36 }
 0x407   :  { %v2077_v42 = vmul.f32 -1.442695, %v838_v34  ;;  %vm236_vm12 = vcmp.eq.f32.partialorder %v235_v8, 8.507059e+37 }
 0x409   :  { %2189 = vpow2.f32 %v2077_v42 }
 0x40f   :  { %v2190_v0 = vpop.eup %2189 }
 0x410   :  { %v846_v1 = vadd.f32 1.0, %v2190_v0 }
 0x412   :  { %2191 = vrcp.f32 %v846_v1  ;;  %v873_v52 = vand.u32 2147483648, %v846_v1  ;;  %v871_v54 = vand.u32 2147483647, %v846_v1  ;;  %vm867_vm14 = vweird.f32 %v846_v1 }
 0x413   :  { %2193 = vrcp.f32 %v209_v9 }
 0x414   :  { %v874_v56 = vor.u32 1.1754944e-38, %v873_v52  ;;  %vm872_vm1 = vcmp.eq.f32.partialorder %v871_v54, 8.507059e+37 }
 0x418   :  { %v2192_v45 = vpop.eup %2191 }
 0x419   :  { %v863_v47 = vmul.f32 %v2192_v45, %v846_v1  ;;  %vm868_vm13 = vweird.f32 %v2192_v45  ;;  %v2194_v18 = vpop.eup %2193 }
 0x41a   :  { %vm869_vm15 = vmor %vm867_vm14, %vm868_vm13  ;;  %v212_v21 = vmul.f32 %v2194_v18, %v209_v9  ;;  %vm217_vm4 = vweird.f32 %v2194_v18 }
 0x41b   :  { %v864_v50 = vsub.f32 1.0, %v863_v47  ;;  %vm218_vm5 = vmor %vm216_vm3, %vm217_vm4  ;;  %v237_v47 = vand.u32 2147483648, %v210_v36 }
 0x41c   :  { %v213_v22 = vsub.f32 1.0, %v212_v21 }
 0x41d   :  { %v865_v53 = vmul.f32 %v2192_v45, %v864_v50  ;;  %v238_v52 = vor.u32 1.1754944e-38, %v237_v47 }
 0x41e   :  { %v214_v27 = vmul.f32 %v2194_v18, %v213_v22  ;;  %v1011_v22 = vld [vmem:[#allocation2 + $0x28] sm:$0xff] }
 0x41f   :  { %v866_v55 = vadd.f32 %v2192_v45, %v865_v53 }
 0x420   :  { %v215_v30 = vadd.f32 %v2194_v18, %v214_v27 }
 0x421   :  { %v870_v20 = vsel %vm869_vm15, %v2192_v45, %v866_v55 }
 0x422   :  { %v2659_v57 = vsel %vm872_vm1, %v874_v56, %v870_v20  ;;  %v219_v32 = vsel %vm218_vm5, %v2194_v18, %v215_v30 }
 0x423   :  { %881 = vrot.lane.b32.xlu2 %v2659_v57, %s2291_s12  ;;  %v933_v55 = vmul.f32 %v2659_v57, %v2604_v41 }
 0x475   :  { %v880_v58 = vpop.permute.xlu1 %879 }
 0x476   :  { %v885_v60 = vmul.f32 %v880_v58, %v2598_v29 }
 0x478   :  { %889 = vrot.lane.b32.xlu1 %v885_v60, %s2288_s19 }
 0x47d   :  { %v882_v61 = vpop.permute.xlu2 %881 }
 0x47e   :  { %v886_v62 = vmul.f32 %v882_v61, %v2604_v41 }
 0x480   :  { %891 = vrot.lane.b32.xlu2 %v886_v62, %s2288_s19 }
 0x4da   :  { %v892_v2 = vpop.permute.xlu2 %891 }
 0x4ea   :  { %v890_v63 = vpop.permute.xlu1 %889 }
 0x4eb   :  { %2078 = vmatmul.msk.f32.vlgmr.msrb.gmra.mxu2 %vm565_vm8, %v890_v63 }
 0x4ec   :  { %2107 = vmatpush.msk.msrb.mxu2 %vm65_vm0, %v2389_v7 }
 0x4f3   :  { %2079 = vmatmul.msk.f32.gmra.mxu2 %vm565_vm8, %v892_v2 }
 0x56e   :  { %v914_v3 = vpop.f32.mrf.mxu2 }
 0x56f   :  { %922 = vrot.lane.b32.xlu0 %v914_v3, %s2287_s18 }
 0x576   :  { %v917_v6 = vpop.f32.mrf.mxu2 }
 0x577   :  { %924 = vrot.lane.b32.xlu1 %v917_v6, %s2287_s18  ;;  %v1010_v6 = vld [vmem:[#allocation2 + $0x20] sm:$0xff] }
 0x5e1   :  { %v923_v59 = vpop.permute.xlu0 %922 }
 0x5e2   :  { %v928_v19 = vadd.f32 %v923_v59, %v2652_v51  ;;  %v223_v51 = vor.u32 1.1754944e-38, %v222_v28 }
 0x5e4   :  { %2195 = vtanh.f32 %v928_v19  ;;  %v224_v35 = vsel %vm221_vm6, %v223_v51, %v219_v32 }
 0x5e9   :  { %v925_v7 = vpop.permute.xlu1 %924 }
 0x5ea   :  { %v2196_v23 = vpop.eup %2195  ;;  %v929_v26 = vadd.f32 %v925_v7, %v813_v25  ;;  %v932_v25 = vmul.f32 %v2655_v40, %v2598_v29  ;;  %v935_v40 = vsub.f32 1.0, %v2659_v57 }
 0x5eb   :  { %938 = vrot.lane.b32.xlu2 %v2196_v23, %s2288_s19 }
 0x5ec   :  { %2197 = vtanh.f32 %v929_v26 }
 0x5ed   :  { %2199 = vrcp.f32 %v210_v36 }
 0x5f2   :  { %v2198_v31 = vpop.eup %2197 }
 0x5f3   :  { %940 = vrot.lane.b32.xlu0 %v2198_v31, %s2288_s19  ;;  %v2200_v42 = vpop.eup %2199 }
 0x5f4   :  { %v227_v0 = vmul.f32 %v2200_v42, %v210_v36  ;;  %vm232_vm10 = vweird.f32 %v2200_v42 }
 0x5f5   :  { %vm233_vm11 = vmor %vm231_vm9, %vm232_vm10 }
 0x5f6   :  { %v228_v1 = vsub.f32 1.0, %v227_v0 }
 0x5f8   :  { %v229_v45 = vmul.f32 %v2200_v42, %v228_v1 }
 0x5fa   :  { %v230_v50 = vadd.f32 %v2200_v42, %v229_v45 }
 0x5fb   :  { %243 = vrot.lane.b32.xlu0 %v224_v35, %s2289_s20 }
 0x5fc   :  { %v234_v53 = vsel %vm233_vm11, %v2200_v42, %v230_v50 }
 0x5fd   :  { %v239_v29 = vsel %vm236_vm12, %v238_v52, %v234_v53 }
 0x645   :  { %v939_v37 = vpop.permute.xlu2 %938 }
 0x646   :  { %v944_v33 = vmul.f32 %v939_v37, %v934_v24 }
 0x648   :  { %v2684_v34 = vadd.f32 %v944_v33, %v932_v25 }
 0x64a   :  { %950 = vrot.lane.b32.xlu1 %v2684_v34, %s2288_s19 }
 0x652   :  { %245 = vrot.lane.b32.xlu1 %v239_v29, %s2289_s20 }
 0x65a   :  { %990 = vrot.lane.b32.xlu1 %v2483_v39, %s2284_s15 }
 0x665   :  { %v941_v54 = vpop.permute.xlu0 %940 }
 0x666   :  { %v945_v56 = vmul.f32 %v941_v54, %v935_v40 }
 0x668   :  { %v2694_v20 = vadd.f32 %v945_v56, %v933_v55 }
 0x66a   :  { %952 = vrot.lane.b32.xlu2 %v2694_v20, %s2288_s19 }
 0x66d   :  { %v244_v58 = vpop.permute.xlu0 %243 }
 0x66e   :  { %250 = vst.msk [vmem:[#allocation3 + $0x20] sm:$0xff] %vm171_vm7, %v244_v58 }
 0x672   :  { %988 = vrot.lane.b32.xlu2 %v2476_v38, %s2284_s15 }
 0x675   :  { %v996_v60 = vld [vmem:[#allocation3 + $0x20] sm:$0xff] }
 0x676   :  { %1000 = vperm.xlu0 %2165, %v996_v60  }
 0x6bc   :  { %v951_v39 = vpop.permute.xlu1 %950 }
 0x6bd   :  { %2080 = vmatmul.msk.f32.vlgmr.msrb.gmra.mxu3 %vm565_vm8, %v951_v39  ;;  %2092 = vmatmul.msk.f32.vlgmr.msra.gmra.mxu2 %vm565_vm8, %v951_v39 }
 0x6be   :  { %1346 = vmatpush.msrb.mxu3 %v2419_v11  ;;  %2122 = vmatpush.msk.msra.mxu2 %vm65_vm0, %v2373_v5 }
 0x6c0   :  { %1347 = vmatpush.msrb.mxu3 %v2424_v12 }
 0x6c2   :  { %1348 = vmatpush.msrb.mxu3 %v2435_v14 }
 0x6c4   :  { %v953_v41 = vpop.permute.xlu2 %952  ;;  %1349 = vmatpush.msrb.mxu3 %v2440_v15  ;;  %v246_v38 = vpop.permute.xlu1 %245 }
 0x6c5   :  { %2081 = vmatmul.msk.f32.gmra.mxu3 %vm565_vm8, %v953_v41  ;;  %2093 = vmatmul.msk.f32.gmra.mxu2 %vm565_vm8, %v953_v41  ;;  %251 = vst.msk [vmem:[#allocation3 + $0x28] sm:$0xff] %vm171_vm7, %v246_v38 }
 0x6cc   :  { %v997_v57 = vld [vmem:[#allocation3 + $0x28] sm:$0xff]  ;;  %v989_v61 = vpop.permute.xlu2 %988  ;;  %v991_v63 = vpop.permute.xlu1 %990 }
 0x6cd   :  { %1005 = vperm.xlu2 %2166, %v997_v57  }
 0x6e8   :  { %v1001_v14 = vpop.permute.xlu0 %1000 }
 0x727   :  { %v1006_v3 = vpop.permute.xlu2 %1005 }
 0x740   :  { %v975_v11 = vpop.f32.mrf.mxu3  ;;  %v1091_v9 = vpop.f32.mrf.mxu2 }
 0x741   :  { %v976_v5 = vadd.f32 %v2628_v46, %v975_v11  ;;  %v2756_v11 = vld [vmem:[%s3105_s3] sm:$0x7] }
 0x743   :  { %2082 = vst.msk [vmem:[%s3111_s9 + $0x10] sm:$0xff] %vm496_vm2, %v976_v5  ;;  %v994_v12 = vsub.f32 %v976_v5, %v989_v61  ;;  %2087 = vmatmul.msk.f32.vlgmr.msra.gmra.mxu0 %vm496_vm2, %v976_v5 }
 0x744   :  { %1429 = vmatpush.msra.mxu0 %v2497_v43 }
 0x745   :  { %v1008_v15 = vmul.f32 %v1001_v14, %v994_v12  ;;  %v2262_v14 = vld [vmem:[%s3102_s0 + $0x20] sm:$0xff] }
 0x746   :  { %1430 = vmatpush.msra.mxu0 %v2504_v44 }
 0x747   :  { %2090 = vmatmul.msk.f32.vlgmr.msra.gmra.mxu1 %vm496_vm2, %v1008_v15  ;;  %v2769_v15 = vld [vmem:[%s3102_s0 + $0x30] sm:$0xff] }
 0x748   :  { %v978_v62 = vpop.f32.mrf.mxu3  ;;  %1431 = vmatpush.msra.mxu0 %v2510_v48  ;;  %1490 = vmatpush.msra.mxu1 %v2567_v10  ;;  %v1094_v28 = vpop.f32.mrf.mxu2 }
 0x749   :  { %v979_v2 = vadd.f32 %v2628_v46, %v978_v62  ;;  %v287_v62 = vsub.f32 %v2769_v15, %v2262_v14 }
 0x74a   :  { %1432 = vmatpush.msra.mxu0 %v2515_v49  ;;  %1491 = vmatpush.msra.mxu1 %v2572_v13 }
 0x74b   :  { %2083 = vst.msk [vmem:[%s3111_s9 + $0x18] sm:$0xff] %vm496_vm2, %v979_v2  ;;  %v995_v43 = vsub.f32 %v979_v2, %v991_v63  ;;  %2088 = vmatmul.msk.f32.gmra.mxu0 %vm496_vm2, %v979_v2  ;;  %vm294_vm9 = vweird.f32 %v287_v62 }
 0x74c   :  { %1492 = vmatpush.msra.mxu1 %v2579_v16 }
 0x74d   :  { %v1009_v44 = vmul.f32 %v1006_v3, %v995_v43 }
 0x74e   :  { %1493 = vmatpush.msra.mxu1 %v2586_v17 }
 0x74f   :  { %2091 = vmatmul.msk.f32.gmra.mxu1 %vm496_vm2, %v1009_v44 }
 0x7c0   :  { %v1035_v48 = vpop.f32.mrf.mxu0 }
 0x7c1   :  { %v1041_v49 = vadd.f32 %v1035_v48, %v1010_v6 }
 0x7c4   :  { %v1066_v59 = vpop.f32.mrf.mxu1 }
 0x7c5   :  { %v2734_v18 = vadd.f32 %v1066_v59, %v1041_v49  ;;  %v300_v59 = vand.u32 2147483648, %v287_v62 }
 0x7c7   :  { %v1097_v19 = vadd.f32 %v1091_v9, %v2734_v18 }
 0x7c8   :  { %v1038_v21 = vpop.f32.mrf.mxu0 }
 0x7c9   :  { %v2094_v7 = vmul.f32 -1.442695, %v1097_v19  ;;  %v1042_v23 = vadd.f32 %v1038_v21, %v1011_v22  ;;  %v298_v21 = vand.u32 2147483647, %v287_v62 }
 0x7cb   :  { %2201 = vpow2.f32 %v2094_v7  ;;  %vm299_vm12 = vcmp.eq.f32.partialorder %v298_v21, 8.507059e+37 }
 0x7cc   :  { %v1069_v26 = vpop.f32.mrf.mxu1 }
 0x7cd   :  { %v2737_v27 = vadd.f32 %v1069_v26, %v1042_v23  ;;  %v2264_v26 = vld [vmem:[%s3102_s0 + $0x28] sm:$0xff] }
 0x7cf   :  { %v1098_v30 = vadd.f32 %v1094_v28, %v2737_v27 }
 0x7d1   :  { %v2202_v4 = vpop.eup %2201  ;;  %v2095_v31 = vmul.f32 -1.442695, %v1098_v30 }
 0x7d2   :  { %v1105_v51 = vadd.f32 1.0, %v2202_v4 }
 0x7d3   :  { %2203 = vpow2.f32 %v2095_v31 }
 0x7d4   :  { %2205 = vrcp.f32 %v1105_v51  ;;  %v1118_v25 = vand.u32 2147483648, %v1105_v51  ;;  %v1116_v42 = vand.u32 2147483647, %v1105_v51  ;;  %vm1112_vm14 = vweird.f32 %v1105_v51 }
 0x7d6   :  { %v1119_v45 = vor.u32 1.1754944e-38, %v1118_v25  ;;  %vm1117_vm1 = vcmp.eq.f32.partialorder %v1116_v42, 8.507059e+37 }
 0x7d9   :  { %v2204_v32 = vpop.eup %2203 }
 0x7da   :  { %v2206_v35 = vpop.eup %2205  ;;  %v1106_v36 = vadd.f32 1.0, %v2204_v32 }
 0x7db   :  { %v1108_v24 = vmul.f32 %v2206_v35, %v1105_v51  ;;  %vm1113_vm13 = vweird.f32 %v2206_v35 }
 0x7dc   :  { %2207 = vrcp.f32 %v1106_v36  ;;  %vm1114_vm15 = vmor %vm1112_vm14, %vm1113_vm13  ;;  %v1133_v53 = vand.u32 2147483648, %v1106_v36  ;;  %v1131_v40 = vand.u32 2147483647, %v1106_v36  ;;  %vm1127_vm4 = vweird.f32 %v1106_v36 }
 0x7dd   :  { %v1109_v37 = vsub.f32 1.0, %v1108_v24  ;;  %2209 = vrcp.f32 %v287_v62 }
 0x7de   :  { %v1134_v55 = vor.u32 1.1754944e-38, %v1133_v53  ;;  %vm1132_vm6 = vcmp.eq.f32.partialorder %v1131_v40, 8.507059e+37  ;;  %v2102_v40 = vld [vmem:[%s3102_s0 + $0x20] sm:$0xff] }
 0x7df   :  { %v1110_v33 = vmul.f32 %v2206_v35, %v1109_v37 }
 0x7e1   :  { %v1111_v0 = vadd.f32 %v2206_v35, %v1110_v33 }
 0x7e2   :  { %v2208_v1 = vpop.eup %2207 }
 0x7e3   :  { %v1115_v47 = vsel %vm1114_vm15, %v2206_v35, %v1111_v0  ;;  %v1123_v50 = vmul.f32 %v2208_v1, %v1106_v36  ;;  %vm1128_vm3 = vweird.f32 %v2208_v1  ;;  %v2210_v2 = vpop.eup %2209 }
 0x7e4   :  { %v2740_v8 = vsel %vm1117_vm1, %v1119_v45, %v1115_v47  ;;  %vm1129_vm5 = vmor %vm1127_vm4, %vm1128_vm3  ;;  %v290_v43 = vmul.f32 %v2210_v2, %v287_v62  ;;  %vm295_vm10 = vweird.f32 %v2210_v2 }
 0x7e5   :  { %1139 = vrot.lane.b32.xlu0 %v2740_v8, %s2291_s12  ;;  %v1124_v52 = vsub.f32 1.0, %v1123_v50  ;;  %vm296_vm11 = vmor %vm294_vm9, %vm295_vm10  ;;  %v1194_v51 = vsub.f32 1.0, %v2740_v8  ;;  %v1192_v36 = vmul.f32 %v2740_v8, %v2684_v34 }
 0x7e6   :  { %v291_v48 = vsub.f32 1.0, %v290_v43  ;;  %v2865_v43 = vld [vmem:[%s3108_s5 + $0x8] sm:$0xff] }
 0x7e7   :  { %v1125_v29 = vmul.f32 %v2208_v1, %v1124_v52 }
 0x7e8   :  { %v292_v9 = vmul.f32 %v2210_v2, %v291_v48 }
 0x7e9   :  { %v1126_v54 = vadd.f32 %v2208_v1, %v1125_v29 }
 0x7ea   :  { %v293_v19 = vadd.f32 %v2210_v2, %v292_v9 }
 0x7eb   :  { %v1130_v56 = vsel %vm1129_vm5, %v2208_v1, %v1126_v54  ;;  %v2811_v54 = vld [vmem:[%s3107_s4 + $0x18] sm:$0xff] }
 0x7ec   :  { %v2744_v58 = vsel %vm1132_vm6, %v1134_v55, %v1130_v56  ;;  %v297_v22 = vsel %vm296_vm11, %v2210_v2, %v293_v19  ;;  %v2267_v55 = vld [vmem:[%s3104_s2] sm:$0x7]  ;;  %v2821_v56 = vld [vmem:[%s3107_s4 + $0x10] sm:$0xff] }
 0x7ed   :  { %1141 = vrot.lane.b32.xlu1 %v2744_v58, %s2291_s12  ;;  %v1195_v1 = vsub.f32 1.0, %v2744_v58 }
 0x857   :  { %v1140_v60 = vpop.permute.xlu0 %1139 }
 0x858   :  { %v1145_v39 = vmul.f32 %v1140_v60, %v2684_v34  ;;  %v1193_v34 = vmul.f32 %v2744_v58, %v2694_v20  ;;  %v2827_v58 = vld [vmem:[%s3107_s4 + $0x8] sm:$0xff] }
 0x85a   :  { %1149 = vrot.lane.b32.xlu2 %v1145_v39, %s2288_s19  ;;  %v2833_v39 = vld [vmem:[%s3107_s4] sm:$0xff] }
 0x85f   :  { %v1142_v41 = vpop.permute.xlu1 %1141 }
 0x860   :  { %v1146_v38 = vmul.f32 %v1142_v41, %v2694_v20  ;;  %v2103_v41 = vld [vmem:[%s3102_s0 + $0x28] sm:$0xff] }
 0x862   :  { %1151 = vrot.lane.b32.xlu0 %v1146_v38, %s2288_s19 }
 0x8b4   :  { %v1150_v57 = vpop.permute.xlu2 %1149 }
 0x8b5   :  { %2096 = vmatmul.msk.f32.vlgmr.msra.gmra.mxu3 %vm565_vm8, %v1150_v57 }
 0x8b6   :  { %2125 = vmatpush.msk.msra.mxu3 %vm65_vm0, %v2756_v11 }
 0x8d4   :  { %v1152_v61 = vpop.permute.xlu0 %1151 }
 0x8d5   :  { %2097 = vmatmul.msk.f32.gmra.mxu3 %vm565_vm8, %v1152_v61 }
 0x938   :  { %v1174_v5 = vpop.f32.mrf.mxu3 }
 0x939   :  { %1182 = vrot.lane.b32.xlu1 %v1174_v5, %s2287_s18 }
 0x958   :  { %v1177_v12 = vpop.f32.mrf.mxu3 }
 0x959   :  { %1184 = vrot.lane.b32.xlu2 %v1177_v12, %s2287_s18 }
 0x9ab   :  { %v1183_v63 = vpop.permute.xlu1 %1182 }
 0x9ac   :  { %v1188_v3 = vadd.f32 %v1183_v63, %v2734_v18  ;;  %v301_v18 = vor.u32 1.1754944e-38, %v300_v59  ;;  %v2852_v63 = vld [vmem:[%s3108_s5 + $0x18] sm:$0xff] }
 0x9ae   :  { %2211 = vtanh.f32 %v1188_v3  ;;  %v302_v23 = vsel %vm299_vm12, %v301_v18, %v297_v22  ;;  %v2858_v3 = vld [vmem:[%s3108_s5 + $0x10] sm:$0xff] }
 0x9b3   :  { %v1185_v44 = vpop.permute.xlu2 %1184 }
 0x9b4   :  { %v2212_v6 = vpop.eup %2211  ;;  %v1189_v49 = vadd.f32 %v1185_v44, %v2737_v27  ;;  %v2783_v27 = vld [vmem:[%s3102_s0 + $0x38] sm:$0xff]  ;;  %v2872_v44 = vld [vmem:[%s3108_s5] sm:$0xff] }
 0x9b5   :  { %1198 = vrot.lane.b32.xlu0 %v2212_v6, %s2288_s19  ;;  %v288_v28 = vsub.f32 %v2783_v27, %v2264_v26 }
 0x9b6   :  { %2213 = vtanh.f32 %v1189_v49 }
 0x9b7   :  { %2215 = vrcp.f32 %v288_v28  ;;  %vm309_vm13 = vweird.f32 %v288_v28  ;;  %v315_v37 = vand.u32 2147483648, %v288_v28  ;;  %v313_v42 = vand.u32 2147483647, %v288_v28 }
 0x9b9   :  { %v316_v0 = vor.u32 1.1754944e-38, %v315_v37  ;;  %vm314_vm1 = vcmp.eq.f32.partialorder %v313_v42, 8.507059e+37 }
 0x9bc   :  { %v2214_v7 = vpop.eup %2213 }
 0x9bd   :  { %1200 = vrot.lane.b32.xlu1 %v2214_v7, %s2288_s19  ;;  %v2216_v30 = vpop.eup %2215 }
 0x9be   :  { %v305_v4 = vmul.f32 %v2216_v30, %v288_v28  ;;  %vm310_vm14 = vweird.f32 %v2216_v30 }
 0x9bf   :  { %vm311_vm15 = vmor %vm309_vm13, %vm310_vm14 }
 0x9c0   :  { %v306_v31 = vsub.f32 1.0, %v305_v4 }
 0x9c2   :  { %v307_v32 = vmul.f32 %v2216_v30, %v306_v31 }
 0x9c4   :  { %v308_v33 = vadd.f32 %v2216_v30, %v307_v32 }
 0x9c5   :  { %321 = vrot.lane.b32.xlu1 %v302_v23, %s2289_s20 }
 0x9c6   :  { %v312_v45 = vsel %vm311_vm15, %v2216_v30, %v308_v33 }
 0x9c7   :  { %v317_v8 = vsel %vm314_vm1, %v316_v0, %v312_v45 }
 0xa27   :  { %v1199_v35 = vpop.permute.xlu0 %1198 }
 0xa28   :  { %v1204_v24 = vmul.f32 %v1199_v35, %v1194_v51 }
 0xa2a   :  { %v2789_v25 = vadd.f32 %v1204_v24, %v1192_v36  ;;  %v1271_v36 = vld [vmem:[#allocation2 + $0x38] sm:$0xff] }
 0xa2c   :  { %1210 = vrot.lane.b32.xlu2 %v2789_v25, %s2288_s19 }
 0xa2f   :  { %v1201_v47 = vpop.permute.xlu1 %1200 }
 0xa30   :  { %v1205_v50 = vmul.f32 %v1201_v47, %v1195_v1 }
 0xa32   :  { %v2796_v52 = vadd.f32 %v1205_v50, %v1193_v34 }
 0xa34   :  { %323 = vrot.lane.b32.xlu2 %v317_v8, %s2289_s20  ;;  %1212 = vrot.lane.b32.xlu0 %v2796_v52, %s2288_s19 }
 0xa37   :  { %v322_v53 = vpop.permute.xlu1 %321 }
 0xa38   :  { %328 = vst.msk [vmem:[#allocation3 + $0x30] sm:$0xff] %vm171_vm7, %v322_v53 }
 0xa3c   :  { %1248 = vrot.lane.b32.xlu0 %v2102_v40, %s2284_s15  ;;  %1250 = vrot.lane.b32.xlu2 %v2103_v41, %s2284_s15 }
 0xa3f   :  { %v1256_v29 = vld [vmem:[#allocation3 + $0x30] sm:$0xff] }
 0xa40   :  { %1260 = vperm.xlu1 %2164, %v1256_v29  }
 0xa86   :  { %v1211_v20 = vpop.permute.xlu2 %1210 }
 0xa87   :  { %2098 = vmatmul.msk.f32.vlgmr.msrb.gmra.mxu0 %vm565_vm8, %v1211_v20  ;;  %2110 = vmatmul.msk.f32.vlgmr.msrb.gmra.mxu3 %vm565_vm8, %v1211_v20 }
 0xa88   :  { %1606 = vmatpush.msrb.mxu0 %v2811_v54  ;;  %2140 = vmatpush.msk.msrb.mxu3 %vm65_vm0, %v2267_v55 }
 0xa8a   :  { %1607 = vmatpush.msrb.mxu0 %v2821_v56 }
 0xa8c   :  { %1608 = vmatpush.msrb.mxu0 %v2827_v58 }
 0xa8e   :  { %v324_v60 = vpop.permute.xlu2 %323  ;;  %1609 = vmatpush.msrb.mxu0 %v2833_v39 }
 0xa8f   :  { %329 = vst.msk [vmem:[#allocation3 + $0x38] sm:$0xff] %vm171_vm7, %v324_v60 }
 0xa96   :  { %v1257_v38 = vld [vmem:[#allocation3 + $0x38] sm:$0xff]  ;;  %v1251_v6 = vpop.permute.xlu2 %1250 }
 0xa97   :  { %1265 = vperm.xlu0 %2165, %v1257_v38  }
 0xaa6   :  { %v1213_v57 = vpop.permute.xlu0 %1212 }
 0xaa7   :  { %2099 = vmatmul.msk.f32.gmra.mxu0 %vm565_vm8, %v1213_v57  ;;  %2111 = vmatmul.msk.f32.gmra.mxu3 %vm565_vm8, %v1213_v57 }
 0xaae   :  { %v1249_v12 = vpop.permute.xlu0 %1248 }
 0xab2   :  { %v1261_v62 = vpop.permute.xlu1 %1260 }
 0xb04   :  { %v1235_v61 = vpop.f32.mrf.mxu0 }
 0xb05   :  { %v1236_v5 = vadd.f32 %v2628_v46, %v1235_v61 }
 0xb07   :  { %2100 = vst.msk [vmem:[%s3111_s9 + $0x20] sm:$0xff] %vm496_vm2, %v1236_v5  ;;  %v1254_v14 = vsub.f32 %v1236_v5, %v1249_v12  ;;  %2105 = vmatmul.msk.f32.vlgmr.msrb.gmra.mxu1 %vm496_vm2, %v1236_v5 }
 0xb08   :  { %1689 = vmatpush.msrb.mxu1 %v2852_v63 }
 0xb09   :  { %v1268_v2 = vmul.f32 %v1261_v62, %v1254_v14  ;;  %v1266_v9 = vpop.permute.xlu0 %1265 }
 0xb0a   :  { %1690 = vmatpush.msrb.mxu1 %v2858_v3  ;;  %v1351_v7 = vpop.f32.mrf.mxu3 }
 0xb0b   :  { %2108 = vmatmul.msk.f32.vlgmr.msrb.gmra.mxu2 %vm496_vm2, %v1268_v2 }
 0xb0c   :  { %1691 = vmatpush.msrb.mxu1 %v2865_v43  ;;  %1750 = vmatpush.msrb.mxu2 %v2567_v10 }
 0xb0e   :  { %1692 = vmatpush.msrb.mxu1 %v2872_v44  ;;  %1751 = vmatpush.msrb.mxu2 %v2572_v13 }
 0xb10   :  { %1752 = vmatpush.msrb.mxu2 %v2579_v16  ;;  %v1270_v16 = vld [vmem:[#allocation2 + $0x30] sm:$0xff] }
 0xb12   :  { %1753 = vmatpush.msrb.mxu2 %v2586_v17 }
 0xb24   :  { %v1238_v48 = vpop.f32.mrf.mxu0 }
 0xb25   :  { %v1239_v49 = vadd.f32 %v2628_v46, %v1238_v48 }
 0xb27   :  { %2101 = vst.msk [vmem:[%s3111_s9 + $0x28] sm:$0xff] %vm496_vm2, %v1239_v49  ;;  %v1255_v10 = vsub.f32 %v1239_v49, %v1251_v6  ;;  %2106 = vmatmul.msk.f32.gmra.mxu1 %vm496_vm2, %v1239_v49 }
 0xb29   :  { %v1269_v59 = vmul.f32 %v1266_v9, %v1255_v10 }
 0xb2a   :  { %v1354_v45 = vpop.f32.mrf.mxu3 }
 0xb2b   :  { %2109 = vmatmul.msk.f32.gmra.mxu2 %vm496_vm2, %v1269_v59 }
 0xb84   :  { %v1295_v13 = vpop.f32.mrf.mxu1 }
 0xb85   :  { %v1301_v19 = vadd.f32 %v1295_v13, %v1270_v16 }
 0xb8e   :  { %v1326_v17 = vpop.f32.mrf.mxu2 }
 0xb8f   :  { %v2885_v21 = vadd.f32 %v1326_v17, %v1301_v19 }
 0xb91   :  { %v1357_v46 = vadd.f32 %v1351_v7, %v2885_v21 }
 0xb93   :  { %v2112_v18 = vmul.f32 -1.442695, %v1357_v46 }
 0xb95   :  { %2217 = vpow2.f32 %v2112_v18 }
 0xb9b   :  { %v2218_v22 = vpop.eup %2217 }
 0xb9c   :  { %v1365_v23 = vadd.f32 1.0, %v2218_v22 }
 0xb9e   :  { %2219 = vrcp.f32 %v1365_v23  ;;  %v1378_v4 = vand.u32 2147483648, %v1365_v23  ;;  %v1376_v51 = vand.u32 2147483647, %v1365_v23  ;;  %vm1372_vm4 = vweird.f32 %v1365_v23 }
 0xba0   :  { %v1379_v24 = vor.u32 1.1754944e-38, %v1378_v4  ;;  %vm1377_vm6 = vcmp.eq.f32.partialorder %v1376_v51, 8.507059e+37  ;;  %v2920_v4 = vld [vmem:[%s3102_s0 + $0x48] sm:$0xff] }
 0xba4   :  { %v2220_v26 = vpop.eup %2219  ;;  %v1298_v32 = vpop.f32.mrf.mxu1 }
 0xba5   :  { %v1368_v28 = vmul.f32 %v2220_v26, %v1365_v23  ;;  %vm1373_vm3 = vweird.f32 %v2220_v26  ;;  %v1302_v37 = vadd.f32 %v1298_v32, %v1271_v36 }
 0xba6   :  { %vm1374_vm5 = vmor %vm1372_vm4, %vm1373_vm3 }
 0xba7   :  { %v1369_v30 = vsub.f32 1.0, %v1368_v28 }
 0xba9   :  { %v1370_v31 = vmul.f32 %v2220_v26, %v1369_v30 }
 0xbab   :  { %v1371_v35 = vadd.f32 %v2220_v26, %v1370_v31  ;;  %v366_v31 = vsub.f32 %v2920_v4, %v2783_v27 }
 0xbad   :  { %v1375_v33 = vsel %vm1374_vm5, %v2220_v26, %v1371_v35  ;;  %vm387_vm1 = vweird.f32 %v366_v31 }
 0xbae   :  { %v1329_v42 = vpop.f32.mrf.mxu2  ;;  %v2888_v0 = vsel %vm1377_vm6, %v1379_v24, %v1375_v33 }
 0xbaf   :  { %v1333_v1 = vadd.f32 %v1329_v42, %v1302_v37  ;;  %1399 = vrot.lane.b32.xlu1 %v2888_v0, %s2291_s12  ;;  %v1454_v36 = vsub.f32 1.0, %v2888_v0  ;;  %v1452_v33 = vmul.f32 %v2888_v0, %v2789_v25 }
 0xbb1   :  { %v1358_v47 = vadd.f32 %v1354_v45, %v1333_v1 }
 0xbb3   :  { %v2113_v34 = vmul.f32 -1.442695, %v1358_v47 }
 0xbb5   :  { %2221 = vpow2.f32 %v2113_v34  ;;  %v391_v34 = vand.u32 2147483647, %v366_v31 }
 0xbb7   :  { %vm392_vm5 = vcmp.eq.f32.partialorder %v391_v34, 8.507059e+37 }
 0xbbb   :  { %v2222_v50 = vpop.eup %2221 }
 0xbbc   :  { %v1366_v8 = vadd.f32 1.0, %v2222_v50 }
 0xbbe   :  { %2223 = vrcp.f32 %v1366_v8  ;;  %v1393_v20 = vand.u32 2147483648, %v1366_v8  ;;  %v1391_v60 = vand.u32 2147483647, %v1366_v8  ;;  %vm1387_vm10 = vweird.f32 %v1366_v8 }
 0xbc0   :  { %v1394_v38 = vor.u32 1.1754944e-38, %v1393_v20  ;;  %vm1392_vm12 = vcmp.eq.f32.partialorder %v1391_v60, 8.507059e+37  ;;  %v2120_v60 = vld [vmem:[%s3102_s0 + $0x30] sm:$0xff] }
 0xbc4   :  { %v2224_v53 = vpop.eup %2223 }
 0xbc5   :  { %v1383_v29 = vmul.f32 %v2224_v53, %v1366_v8  ;;  %vm1388_vm9 = vweird.f32 %v2224_v53 }
 0xbc6   :  { %vm1389_vm11 = vmor %vm1387_vm10, %vm1388_vm9 }
 0xbc7   :  { %v1384_v40 = vsub.f32 1.0, %v1383_v29 }
 0xbc9   :  { %v1385_v55 = vmul.f32 %v2224_v53, %v1384_v40 }
 0xbcb   :  { %v1386_v41 = vadd.f32 %v2224_v53, %v1385_v55 }
 0xbcd   :  { %v1390_v57 = vsel %vm1389_vm11, %v2224_v53, %v1386_v41 }
 0xbce   :  { %v2892_v61 = vsel %vm1392_vm12, %v1394_v38, %v1390_v57 }
 0xbcf   :  { %1401 = vrot.lane.b32.xlu2 %v2892_v61, %s2291_s12  ;;  %v1455_v50 = vsub.f32 1.0, %v2892_v61 }
 0xc21   :  { %v1400_v5 = vpop.permute.xlu1 %1399 }
 0xc22   :  { %v1405_v12 = vmul.f32 %v1400_v5, %v2789_v25  ;;  %v1453_v25 = vmul.f32 %v2892_v61, %v2796_v52 }
 0xc24   :  { %1409 = vrot.lane.b32.xlu0 %v1405_v12, %s2288_s19 }
 0xc29   :  { %v1402_v14 = vpop.permute.xlu2 %1401 }
 0xc2a   :  { %v1406_v62 = vmul.f32 %v1402_v14, %v2796_v52  ;;  %v2121_v52 = vld [vmem:[%s3102_s0 + $0x38] sm:$0xff] }
 0xc2c   :  { %1411 = vrot.lane.b32.xlu1 %v1406_v62, %s2288_s19 }
 0xc96   :  { %v1410_v2 = vpop.permute.xlu0 %1409 }
 0xc97   :  { %2114 = vmatmul.msk.f32.vlgmr.msra.gmra.mxu0 %vm565_vm8, %v1410_v2 }
 0xc98   :  { %2143 = vmatpush.msk.msra.mxu0 %vm65_vm0, %v2756_v11  ;;  %v2911_v11 = vld [vmem:[%s3102_s0 + $0x40] sm:$0xff] }
 0xc99   :  { %v365_v13 = vsub.f32 %v2911_v11, %v2769_v15 }
 0xc9b   :  { %vm372_vm0 = vweird.f32 %v365_v13  ;;  %v378_v18 = vand.u32 2147483648, %v365_v13  ;;  %v376_v23 = vand.u32 2147483647, %v365_v13 }
 0xc9d   :  { %v379_v28 = vor.u32 1.1754944e-38, %v378_v18  ;;  %vm377_vm15 = vcmp.eq.f32.partialorder %v376_v23, 8.507059e+37  ;;  %v1531_v18 = vld [vmem:[#allocation2 + $0x48] sm:$0xff] }
 0xc9e   :  { %v1412_v48 = vpop.permute.xlu1 %1411 }
 0xc9f   :  { %2115 = vmatmul.msk.f32.gmra.mxu0 %vm565_vm8, %v1412_v48  ;;  %v2278_v48 = vld [vmem:[%s3109_s7 + $0x18] sm:$0xff] }
 0xd14   :  { %v1434_v6 = vpop.f32.mrf.mxu0 }
 0xd15   :  { %1442 = vrot.lane.b32.xlu2 %v1434_v6, %s2287_s18 }
 0xd1c   :  { %v1437_v49 = vpop.f32.mrf.mxu0 }
 0xd1d   :  { %1444 = vrot.lane.b32.xlu0 %v1437_v49, %s2287_s18  ;;  %v2280_v49 = vld [vmem:[%s3109_s7 + $0x8] sm:$0xff] }
 0xd6f   :  { %v1443_v10 = vpop.permute.xlu2 %1442 }
 0xd70   :  { %v1448_v9 = vadd.f32 %v1443_v10, %v2885_v21  ;;  %v2281_v10 = vld [vmem:[%s3109_s7] sm:$0xff] }
 0xd72   :  { %2225 = vtanh.f32 %v1448_v9 }
 0xd73   :  { %2227 = vrcp.f32 %v365_v13 }
 0xd78   :  { %v2226_v59 = vpop.eup %2225 }
 0xd79   :  { %1458 = vrot.lane.b32.xlu1 %v2226_v59, %s2288_s19  ;;  %v2228_v16 = vpop.eup %2227  ;;  %v1530_v59 = vld [vmem:[#allocation2 + $0x40] sm:$0xff] }
 0xd7a   :  { %v368_v19 = vmul.f32 %v2228_v16, %v365_v13  ;;  %vm373_vm13 = vweird.f32 %v2228_v16 }
 0xd7b   :  { %vm374_vm14 = vmor %vm372_vm0, %vm373_vm13 }
 0xd7c   :  { %v369_v7 = vsub.f32 1.0, %v368_v19 }
 0xd7e   :  { %v370_v21 = vmul.f32 %v2228_v16, %v369_v7 }
 0xd80   :  { %v371_v22 = vadd.f32 %v2228_v16, %v370_v21 }
 0xd82   :  { %v375_v30 = vsel %vm374_vm14, %v2228_v16, %v371_v22 }
 0xd83   :  { %v380_v15 = vsel %vm377_vm15, %v379_v28, %v375_v30 }
 0xd8f   :  { %v1445_v17 = vpop.permute.xlu0 %1444 }
 0xd90   :  { %v1449_v46 = vadd.f32 %v1445_v17, %v1333_v1  ;;  %v393_v1 = vand.u32 2147483648, %v366_v31 }
 0xd92   :  { %2229 = vtanh.f32 %v1449_v46  ;;  %v394_v27 = vor.u32 1.1754944e-38, %v393_v1 }
 0xd93   :  { %2231 = vrcp.f32 %v366_v31 }
 0xd98   :  { %v2230_v26 = vpop.eup %2229 }
 0xd99   :  { %1460 = vrot.lane.b32.xlu2 %v2230_v26, %s2288_s19  ;;  %v2232_v51 = vpop.eup %2231 }
 0xd9a   :  { %v383_v32 = vmul.f32 %v2232_v51, %v366_v31  ;;  %vm388_vm3 = vweird.f32 %v2232_v51 }
 0xd9b   :  { %vm389_vm4 = vmor %vm387_vm1, %vm388_vm3 }
 0xd9c   :  { %v384_v35 = vsub.f32 1.0, %v383_v32 }
 0xd9e   :  { %v385_v24 = vmul.f32 %v2232_v51, %v384_v35 }
 0xda0   :  { %v386_v47 = vadd.f32 %v2232_v51, %v385_v24 }
 0xda1   :  { %399 = vrot.lane.b32.xlu2 %v380_v15, %s2289_s20 }
 0xda2   :  { %v390_v8 = vsel %vm389_vm4, %v2232_v51, %v386_v47 }
 0xda3   :  { %v395_v29 = vsel %vm392_vm5, %v394_v27, %v390_v8 }
 0xdeb   :  { %v1459_v37 = vpop.permute.xlu1 %1458 }
 0xdec   :  { %v1464_v42 = vmul.f32 %v1459_v37, %v1454_v36 }
 0xdee   :  { %v2927_v45 = vadd.f32 %v1464_v42, %v1452_v33 }
 0xdf0   :  { %1470 = vrot.lane.b32.xlu0 %v2927_v45, %s2288_s19 }
 0xdf3   :  { %v1461_v53 = vpop.permute.xlu2 %1460 }
 0xdf4   :  { %v1465_v0 = vmul.f32 %v1461_v53, %v1455_v50 }
 0xdf6   :  { %v2934_v40 = vadd.f32 %v1465_v0, %v1453_v25 }
 0xdf8   :  { %401 = vrot.lane.b32.xlu0 %v395_v29, %s2289_s20  ;;  %1472 = vrot.lane.b32.xlu1 %v2934_v40, %s2288_s19 }
 0xdfb   :  { %v400_v20 = vpop.permute.xlu2 %399 }
 0xdfc   :  { %406 = vst.msk [vmem:[#allocation3 + $0x40] sm:$0xff] %vm171_vm7, %v400_v20 }
 0xe00   :  { %1508 = vrot.lane.b32.xlu1 %v2120_v60, %s2284_s15  ;;  %1510 = vrot.lane.b32.xlu0 %v2121_v52, %s2284_s15 }
 0xe03   :  { %v1516_v55 = vld [vmem:[#allocation3 + $0x40] sm:$0xff] }
 0xe04   :  { %1520 = vperm.xlu2 %2166, %v1516_v55  }
 0xe5e   :  { %v1521_v12 = vpop.permute.xlu2 %1520 }
 0xe62   :  { %v1471_v41 = vpop.permute.xlu0 %1470 }
 0xe63   :  { %2116 = vmatmul.msk.f32.vlgmr.msra.gmra.mxu1 %vm565_vm8, %v1471_v41  ;;  %2128 = vmatmul.msk.f32.vlgmr.msrb.gmra.mxu0 %vm565_vm8, %v1471_v41 }
 0xe64   :  { %1866 = vmatpush.msra.mxu1 %v2811_v54  ;;  %v2960_v54 = vld [vmem:[%s3110_s8] ss:$0 sm:$0xff] }
 0xe66   :  { %1867 = vmatpush.msra.mxu1 %v2821_v56 }
 0xe68   :  { %1868 = vmatpush.msra.mxu1 %v2827_v58 }
 0xe6a   :  { %v402_v38 = vpop.permute.xlu0 %401  ;;  %v1473_v57 = vpop.permute.xlu1 %1472  ;;  %1869 = vmatpush.msra.mxu1 %v2833_v39 }
 0xe6b   :  { %407 = vst.msk [vmem:[#allocation3 + $0x48] sm:$0xff] %vm171_vm7, %v402_v38  ;;  %2117 = vmatmul.msk.f32.gmra.mxu1 %vm565_vm8, %v1473_v57  ;;  %2129 = vmatmul.msk.f32.gmra.mxu0 %vm565_vm8, %v1473_v57 }
 0xe72   :  { %v1517_v61 = vld [vmem:[#allocation3 + $0x48] sm:$0xff]  ;;  %v1509_v58 = vpop.permute.xlu1 %1508  ;;  %v1511_v2 = vpop.permute.xlu0 %1510 }
 0xe73   :  { %1525 = vperm.xlu1 %2164, %v1517_v61  }
 0xee0   :  { %v1495_v5 = vpop.f32.mrf.mxu1  ;;  %v1611_v16 = vpop.f32.mrf.mxu0 }
 0xee1   :  { %v1496_v56 = vadd.f32 %v2960_v54, %v1495_v5 }
 0xee3   :  { %2118 = vst.msk [vmem:[%s3111_s9 + $0x30] sm:$0xff] %vm496_vm2, %v1496_v56  ;;  %v1514_v39 = vsub.f32 %v1496_v56, %v1509_v58  ;;  %2123 = vmatmul.msk.f32.vlgmr.msra.gmra.mxu2 %vm496_vm2, %v1496_v56 }
 0xee4   :  { %1949 = vmatpush.msra.mxu2 %v2852_v63  ;;  %v2279_v63 = vld [vmem:[%s3109_s7 + $0x10] sm:$0xff] }
 0xee5   :  { %v1528_v14 = vmul.f32 %v1521_v12, %v1514_v39 }
 0xee6   :  { %1950 = vmatpush.msra.mxu2 %v2858_v3 }
 0xee7   :  { %2126 = vmatmul.msk.f32.vlgmr.msra.gmra.mxu3 %vm496_vm2, %v1528_v14  ;;  %v2282_v14 = vld [vmem:[%s3102_s0 + $0x50] sm:$0xff] }
 0xee8   :  { %v1498_v62 = vpop.f32.mrf.mxu1  ;;  %1951 = vmatpush.msra.mxu2 %v2865_v43  ;;  %2010 = vmatpush.msra.mxu3 %v2278_v48  ;;  %v1526_v43 = vpop.permute.xlu1 %1525 }
 0xee9   :  { %v1499_v6 = vadd.f32 %v2960_v54, %v1498_v62  ;;  %v1614_v28 = vpop.f32.mrf.mxu0  ;;  %v443_v62 = vsub.f32 %v2282_v14, %v2911_v11 }
 0xeea   :  { %1952 = vmatpush.msra.mxu2 %v2872_v44  ;;  %2011 = vmatpush.msra.mxu3 %v2279_v63 }
 0xeeb   :  { %2119 = vst.msk [vmem:[%s3111_s9 + $0x38] sm:$0xff] %vm496_vm2, %v1499_v6  ;;  %v1515_v3 = vsub.f32 %v1499_v6, %v1511_v2  ;;  %2124 = vmatmul.msk.f32.gmra.mxu2 %vm496_vm2, %v1499_v6  ;;  %vm450_vm15 = vweird.f32 %v443_v62 }
 0xeec   :  { %2012 = vmatpush.msra.mxu3 %v2280_v49 }
 0xeed   :  { %v1529_v44 = vmul.f32 %v1526_v43, %v1515_v3 }
 0xeee   :  { %2013 = vmatpush.msra.mxu3 %v2281_v10 }
 0xeef   :  { %2127 = vmatmul.msk.f32.gmra.mxu3 %vm496_vm2, %v1529_v44 }
 0xf66   :  { %v1555_v9 = vpop.f32.mrf.mxu2 }
 0xf67   :  { %v1561_v13 = vadd.f32 %v1555_v9, %v1530_v59  ;;  %v456_v9 = vand.u32 2147483648, %v443_v62  ;;  %v454_v59 = vand.u32 2147483647, %v443_v62 }
 0xf69   :  { %vm455_vm4 = vcmp.eq.f32.partialorder %v454_v59, 8.507059e+37 }
 0xf6a   :  { %v1586_v19 = vpop.f32.mrf.mxu3 }
 0xf6b   :  { %v2992_v17 = vadd.f32 %v1586_v19, %v1561_v13 }
 0xf6d   :  { %v1617_v7 = vadd.f32 %v1611_v16, %v2992_v17  ;;  %v457_v16 = vor.u32 1.1754944e-38, %v456_v9 }
 0xf6e   :  { %v1558_v46 = vpop.f32.mrf.mxu2 }
 0xf6f   :  { %v2130_v21 = vmul.f32 -1.442695, %v1617_v7  ;;  %v1562_v22 = vadd.f32 %v1558_v46, %v1531_v18  ;;  %v2283_v7 = vld [vmem:[%s3102_s0 + $0x58] sm:$0xff] }
 0xf70   :  { %v444_v46 = vsub.f32 %v2283_v7, %v2920_v4 }
 0xf71   :  { %2233 = vpow2.f32 %v2130_v21 }
 0xf72   :  { %v1589_v23 = vpop.f32.mrf.mxu3  ;;  %vm465_vm5 = vweird.f32 %v444_v46 }
 0xf73   :  { %v2995_v26 = vadd.f32 %v1589_v23, %v1562_v22 }
 0xf75   :  { %v1618_v30 = vadd.f32 %v1614_v28, %v2995_v26 }
 0xf77   :  { %v2234_v15 = vpop.eup %2233  ;;  %v2131_v31 = vmul.f32 -1.442695, %v1618_v30 }
 0xf78   :  { %v1625_v51 = vadd.f32 1.0, %v2234_v15 }
 0xf79   :  { %2235 = vpow2.f32 %v2131_v31  ;;  %v471_v31 = vand.u32 2147483648, %v444_v46 }
 0xf7a   :  { %2237 = vrcp.f32 %v1625_v51  ;;  %v1638_v33 = vand.u32 2147483648, %v1625_v51  ;;  %v1636_v1 = vand.u32 2147483647, %v1625_v51  ;;  %vm1632_vm9 = vweird.f32 %v1625_v51 }
 0xf7b   :  { %v472_v4 = vor.u32 1.1754944e-38, %v471_v31 }
 0xf7c   :  { %v1639_v27 = vor.u32 1.1754944e-38, %v1638_v33  ;;  %vm1637_vm11 = vcmp.eq.f32.partialorder %v1636_v1, 8.507059e+37 }
 0xf7f   :  { %v2236_v32 = vpop.eup %2235 }
 0xf80   :  { %v2238_v35 = vpop.eup %2237  ;;  %v1626_v36 = vadd.f32 1.0, %v2236_v32 }
 0xf81   :  { %v1628_v24 = vmul.f32 %v2238_v35, %v1625_v51  ;;  %vm1633_vm6 = vweird.f32 %v2238_v35 }
 0xf82   :  { %2239 = vrcp.f32 %v1626_v36  ;;  %vm1634_vm10 = vmor %vm1632_vm9, %vm1633_vm6  ;;  %v1653_v0 = vand.u32 2147483648, %v1626_v36  ;;  %v1651_v20 = vand.u32 2147483647, %v1626_v36  ;;  %vm1647_vm0 = vweird.f32 %v1626_v36 }
 0xf83   :  { %v1629_v37 = vsub.f32 1.0, %v1628_v24  ;;  %2241 = vrcp.f32 %v443_v62 }
 0xf84   :  { %v1654_v60 = vor.u32 1.1754944e-38, %v1653_v0  ;;  %vm1652_vm14 = vcmp.eq.f32.partialorder %v1651_v20, 8.507059e+37 }
 0xf85   :  { %v1630_v42 = vmul.f32 %v2238_v35, %v1629_v37 }
 0xf87   :  { %v1631_v47 = vadd.f32 %v2238_v35, %v1630_v42 }
 0xf88   :  { %v2240_v34 = vpop.eup %2239 }
 0xf89   :  { %v1635_v50 = vsel %vm1634_vm10, %v2238_v35, %v1631_v47  ;;  %v1643_v8 = vmul.f32 %v2240_v34, %v1626_v36  ;;  %vm1648_vm12 = vweird.f32 %v2240_v34  ;;  %v2242_v48 = vpop.eup %2241  ;;  %v469_v35 = vand.u32 2147483647, %v444_v46 }
 0xf8a   :  { %v2998_v53 = vsel %vm1637_vm11, %v1639_v27, %v1635_v50  ;;  %vm1649_vm13 = vmor %vm1647_vm0, %vm1648_vm12  ;;  %v446_v63 = vmul.f32 %v2242_v48, %v443_v62  ;;  %vm451_vm1 = vweird.f32 %v2242_v48  ;;  %v2138_v27 = vld [vmem:[%s3102_s0 + $0x40] sm:$0xff] }
 0xf8b   :  { %1659 = vrot.lane.b32.xlu2 %v2998_v53, %s2291_s12  ;;  %v1644_v25 = vsub.f32 1.0, %v1643_v8  ;;  %vm452_vm3 = vmor %vm450_vm15, %vm451_vm1  ;;  %v1714_v23 = vsub.f32 1.0, %v2998_v53  ;;  %v1712_v30 = vmul.f32 %v2998_v53, %v2927_v45  ;;  %vm470_vm10 = vcmp.eq.f32.partialorder %v469_v35, 8.507059e+37 }
 0xf8c   :  { %v447_v43 = vsub.f32 1.0, %v446_v63  ;;  %v1791_v63 = vld [vmem:[#allocation2 + $0x58] sm:$0xff] }
 0xf8d   :  { %v1645_v29 = vmul.f32 %v2240_v34, %v1644_v25 }
 0xf8e   :  { %v448_v10 = vmul.f32 %v2242_v48, %v447_v43 }
 0xf8f   :  { %v1646_v55 = vadd.f32 %v2240_v34, %v1645_v29 }
 0xf90   :  { %v449_v11 = vadd.f32 %v2242_v48, %v448_v10 }
 0xf91   :  { %v1650_v52 = vsel %vm1649_vm13, %v2240_v34, %v1646_v55 }
 0xf92   :  { %v3002_v41 = vsel %vm1652_vm14, %v1654_v60, %v1650_v52  ;;  %v453_v19 = vsel %vm452_vm3, %v2242_v48, %v449_v11 }
 0xf93   :  { %1661 = vrot.lane.b32.xlu0 %v3002_v41, %s2291_s12  ;;  %v1713_v33 = vmul.f32 %v3002_v41, %v2934_v40 }
 0xfe5   :  { %v1660_v38 = vpop.permute.xlu2 %1659 }
 0xfe6   :  { %v1665_v57 = vmul.f32 %v1660_v38, %v2927_v45  ;;  %v1715_v45 = vsub.f32 1.0, %v3002_v41 }
 0xfe8   :  { %1669 = vrot.lane.b32.xlu1 %v1665_v57, %s2288_s19 }
0x1005   :  { %v1662_v61 = vpop.permute.xlu0 %1661 }
0x1006   :  { %v1666_v5 = vmul.f32 %v1662_v61, %v2934_v40  ;;  %v2139_v40 = vld [vmem:[%s3102_s0 + $0x48] sm:$0xff] }
0x1008   :  { %1671 = vrot.lane.b32.xlu2 %v1666_v5, %s2288_s19 }
0x105a   :  { %v1670_v56 = vpop.permute.xlu1 %1669 }
0x105b   :  { %2132 = vmatmul.msk.f32.vlgmr.msrb.gmra.mxu1 %vm565_vm8, %v1670_v56 }
0x1062   :  { %v1672_v58 = vpop.permute.xlu2 %1671 }
0x1063   :  { %2133 = vmatmul.msk.f32.gmra.mxu1 %vm565_vm8, %v1672_v58 }
0x10d8   :  { %v1694_v39 = vpop.f32.mrf.mxu1 }
0x10d9   :  { %1702 = vrot.lane.b32.xlu0 %v1694_v39, %s2287_s18  ;;  %v1790_v39 = vld [vmem:[#allocation2 + $0x50] sm:$0xff] }
0x10e0   :  { %v1697_v12 = vpop.f32.mrf.mxu1 }
0x10e1   :  { %1704 = vrot.lane.b32.xlu1 %v1697_v12, %s2287_s18 }
0x114b   :  { %v1703_v2 = vpop.permute.xlu0 %1702 }
0x114c   :  { %v1708_v6 = vadd.f32 %v1703_v2, %v2992_v17  ;;  %v458_v17 = vsel %vm455_vm4, %v457_v16, %v453_v19 }
0x114e   :  { %2243 = vtanh.f32 %v1708_v6 }
0x1153   :  { %v1705_v3 = vpop.permute.xlu1 %1704 }
0x1154   :  { %v2244_v49 = vpop.eup %2243  ;;  %v1709_v44 = vadd.f32 %v1705_v3, %v2995_v26 }
0x1155   :  { %1718 = vrot.lane.b32.xlu2 %v2244_v49, %s2288_s19 }
0x1156   :  { %2245 = vtanh.f32 %v1709_v44 }
0x1157   :  { %2247 = vrcp.f32 %v444_v46 }
0x115c   :  { %v2246_v13 = vpop.eup %2245 }
0x115d   :  { %1720 = vrot.lane.b32.xlu0 %v2246_v13, %s2288_s19  ;;  %v2248_v21 = vpop.eup %2247 }
0x115e   :  { %v461_v18 = vmul.f32 %v2248_v21, %v444_v46  ;;  %vm466_vm6 = vweird.f32 %v2248_v21 }
0x115f   :  { %vm467_vm9 = vmor %vm465_vm5, %vm466_vm6 }
0x1160   :  { %v462_v22 = vsub.f32 1.0, %v461_v18 }
0x1162   :  { %v463_v26 = vmul.f32 %v2248_v21, %v462_v22 }
0x1164   :  { %v464_v32 = vadd.f32 %v2248_v21, %v463_v26 }
0x1165   :  { %477 = vrot.lane.b32.xlu0 %v458_v17, %s2289_s20 }
0x1166   :  { %v468_v36 = vsel %vm467_vm9, %v2248_v21, %v464_v32 }
0x1167   :  { %v473_v24 = vsel %vm470_vm10, %v472_v4, %v468_v36 }
0x11af   :  { %v1719_v28 = vpop.permute.xlu2 %1718 }
0x11b0   :  { %v1724_v15 = vmul.f32 %v1719_v28, %v1714_v23 }
0x11b2   :  { %v3030_v51 = vadd.f32 %v1724_v15, %v1712_v30 }
0x11b4   :  { %1730 = vrot.lane.b32.xlu1 %v3030_v51, %s2288_s19 }
0x11bc   :  { %479 = vrot.lane.b32.xlu1 %v473_v24, %s2289_s20 }
0x11c4   :  { %1770 = vrot.lane.b32.xlu1 %v2139_v40, %s2284_s15 }
0x11cf   :  { %v1721_v37 = vpop.permute.xlu0 %1720 }
0x11d0   :  { %v1725_v42 = vmul.f32 %v1721_v37, %v1715_v45 }
0x11d2   :  { %v3038_v1 = vadd.f32 %v1725_v42, %v1713_v33 }
0x11d4   :  { %1732 = vrot.lane.b32.xlu2 %v3038_v1, %s2288_s19 }
0x11d7   :  { %v478_v47 = vpop.permute.xlu0 %477 }
0x11d8   :  { %484 = vst.msk [vmem:[#allocation3 + $0x50] sm:$0xff] %vm171_vm7, %v478_v47 }
0x11dc   :  { %1768 = vrot.lane.b32.xlu2 %v2138_v27, %s2284_s15 }
0x11df   :  { %v1776_v34 = vld [vmem:[#allocation3 + $0x50] sm:$0xff] }
0x11e0   :  { %1780 = vperm.xlu0 %2165, %v1776_v34  }
0x1226   :  { %v1731_v50 = vpop.permute.xlu1 %1730 }
0x1227   :  { %2134 = vmatmul.msk.f32.vlgmr.msrb.gmra.mxu2 %vm565_vm8, %v1731_v50  ;;  %2146 = vmatmul.msk.f32.vlgmr.msra.gmra.mxu1 %vm565_vm8, %v1731_v50 }
0x122e   :  { %v1733_v8 = vpop.permute.xlu2 %1732  ;;  %v480_v53 = vpop.permute.xlu1 %479 }
0x122f   :  { %485 = vst.msk [vmem:[#allocation3 + $0x58] sm:$0xff] %vm171_vm7, %v480_v53  ;;  %2135 = vmatmul.msk.f32.gmra.mxu2 %vm565_vm8, %v1733_v8  ;;  %2147 = vmatmul.msk.f32.gmra.mxu1 %vm565_vm8, %v1733_v8 }
0x1236   :  { %v1777_v25 = vld [vmem:[#allocation3 + $0x58] sm:$0xff]  ;;  %v1769_v20 = vpop.permute.xlu2 %1768  ;;  %v1771_v38 = vpop.permute.xlu1 %1770 }
0x1237   :  { %1785 = vperm.xlu2 %2166, %v1777_v25  }
0x1252   :  { %v1781_v60 = vpop.permute.xlu0 %1780 }
0x1291   :  { %v1786_v5 = vpop.permute.xlu2 %1785 }
0x12a4   :  { %v1871_v62 = vpop.f32.mrf.mxu1 }
0x12aa   :  { %v1755_v0 = vpop.f32.mrf.mxu2 }
0x12ab   :  { %v1756_v29 = vadd.f32 %v2960_v54, %v1755_v0 }
0x12ac   :  { %v1874_v10 = vpop.f32.mrf.mxu1 }
0x12ad   :  { %2136 = vst.msk [vmem:[%s3111_s9 + $0x40] sm:$0xff] %vm496_vm2, %v1756_v29  ;;  %v1774_v55 = vsub.f32 %v1756_v29, %v1769_v20  ;;  %2141 = vmatmul.msk.f32.vlgmr.msrb.gmra.mxu3 %vm496_vm2, %v1756_v29 }
0x12af   :  { %v1788_v52 = vmul.f32 %v1781_v60, %v1774_v55 }
0x12b1   :  { %2144 = vmatmul.msk.f32.vlgmr.msra.gmra.mxu0 %vm496_vm2, %v1788_v52 }
0x12b2   :  { %v1758_v41 = vpop.f32.mrf.mxu2 }
0x12b3   :  { %v1759_v57 = vadd.f32 %v2960_v54, %v1758_v41 }
0x12b5   :  { %2137 = vst.msk [vmem:[%s3111_s9 + $0x48] sm:$0xff] %vm496_vm2, %v1759_v57  ;;  %v1775_v61 = vsub.f32 %v1759_v57, %v1771_v38  ;;  %2142 = vmatmul.msk.f32.gmra.mxu3 %vm496_vm2, %v1759_v57 }
0x12b7   :  { %v1789_v56 = vmul.f32 %v1786_v5, %v1775_v61 }
0x12b9   :  { %2145 = vmatmul.msk.f32.gmra.mxu0 %vm496_vm2, %v1789_v56 }
0x132e   :  { %v1846_v58 = vpop.f32.mrf.mxu0 }
0x1330   :  { %v1815_v12 = vpop.f32.mrf.mxu3 }
0x1331   :  { %v1821_v14 = vadd.f32 %v1815_v12, %v1790_v39 }
0x1333   :  { %v3070_v2 = vadd.f32 %v1846_v58, %v1821_v14 }
0x1335   :  { %v1877_v48 = vadd.f32 %v1871_v62, %v3070_v2 }
0x1336   :  { %v1849_v49 = vpop.f32.mrf.mxu0 }
0x1337   :  { %v2148_v6 = vmul.f32 -1.442695, %v1877_v48 }
0x1338   :  { %v1818_v3 = vpop.f32.mrf.mxu3 }
0x1339   :  { %2249 = vpow2.f32 %v2148_v6  ;;  %v1822_v43 = vadd.f32 %v1818_v3, %v1791_v63 }
0x133b   :  { %v1853_v44 = vadd.f32 %v1849_v49, %v1822_v43 }
0x133d   :  { %v1878_v9 = vadd.f32 %v1874_v10, %v1853_v44 }
0x133f   :  { %v2250_v11 = vpop.eup %2249  ;;  %v2149_v59 = vmul.f32 -1.442695, %v1878_v9 }
0x1340   :  { %v1885_v13 = vadd.f32 1.0, %v2250_v11 }
0x1341   :  { %2251 = vpow2.f32 %v2149_v59 }
0x1342   :  { %2253 = vrcp.f32 %v1885_v13  ;;  %v1898_v21 = vand.u32 2147483648, %v1885_v13  ;;  %v1896_v22 = vand.u32 2147483647, %v1885_v13  ;;  %vm1892_vm11 = vweird.f32 %v1885_v13 }
0x1344   :  { %v1899_v28 = vor.u32 1.1754944e-38, %v1898_v21  ;;  %vm1897_vm0 = vcmp.eq.f32.partialorder %v1896_v22, 8.507059e+37 }
0x1347   :  { %v2252_v16 = vpop.eup %2251 }
0x1348   :  { %v2254_v19 = vpop.eup %2253  ;;  %v1886_v17 = vadd.f32 1.0, %v2252_v16 }
0x1349   :  { %v1888_v7 = vmul.f32 %v2254_v19, %v1885_v13  ;;  %vm1893_vm7 = vweird.f32 %v2254_v19 }
0x134a   :  { %2255 = vrcp.f32 %v1886_v17  ;;  %vm1894_vm12 = vmor %vm1892_vm11, %vm1893_vm7  ;;  %v1913_v35 = vand.u32 2147483648, %v1886_v17  ;;  %v1911_v36 = vand.u32 2147483647, %v1886_v17  ;;  %vm1907_vm14 = vweird.f32 %v1886_v17 }
0x134b   :  { %v1889_v46 = vsub.f32 1.0, %v1888_v7 }
0x134c   :  { %v1914_v45 = vor.u32 1.1754944e-38, %v1913_v35  ;;  %vm1912_vm1 = vcmp.eq.f32.partialorder %v1911_v36, 8.507059e+37 }
0x134d   :  { %v1890_v18 = vmul.f32 %v2254_v19, %v1889_v46 }
0x134f   :  { %v1891_v23 = vadd.f32 %v2254_v19, %v1890_v18 }
0x1350   :  { %v2256_v26 = vpop.eup %2255 }
0x1351   :  { %v1895_v30 = vsel %vm1894_vm12, %v2254_v19, %v1891_v23  ;;  %v1903_v15 = vmul.f32 %v2256_v26, %v1886_v17  ;;  %vm1908_vm13 = vweird.f32 %v2256_v26 }
0x1352   :  { %v1900_v31 = vsel %vm1897_vm0, %v1899_v28, %v1895_v30  ;;  %vm1909_vm15 = vmor %vm1907_vm14, %vm1908_vm13 }
0x1353   :  { %1919 = vrot.lane.b32.xlu0 %v1900_v31, %s2291_s12  ;;  %v1904_v32 = vsub.f32 1.0, %v1903_v15  ;;  %v1974_v52 = vsub.f32 1.0, %v1900_v31  ;;  %v1972_v38 = vmul.f32 %v1900_v31, %v3030_v51 }
0x1355   :  { %v1905_v4 = vmul.f32 %v2256_v26, %v1904_v32 }
0x1357   :  { %v1906_v24 = vadd.f32 %v2256_v26, %v1905_v4 }
0x1359   :  { %v1910_v37 = vsel %vm1909_vm15, %v2256_v26, %v1906_v24 }
0x135a   :  { %v1915_v33 = vsel %vm1912_vm1, %v1914_v45, %v1910_v37 }
0x135b   :  { %1921 = vrot.lane.b32.xlu1 %v1915_v33, %s2291_s12  ;;  %v1975_v5 = vsub.f32 1.0, %v1915_v33  ;;  %v1973_v58 = vmul.f32 %v1915_v33, %v3038_v1 }
0x13c5   :  { %v1920_v42 = vpop.permute.xlu0 %1919 }
0x13c6   :  { %v1925_v47 = vmul.f32 %v1920_v42, %v3030_v51 }
0x13c8   :  { %1929 = vrot.lane.b32.xlu2 %v1925_v47, %s2288_s19 }
0x13cd   :  { %v1922_v34 = vpop.permute.xlu1 %1921 }
0x13ce   :  { %v1926_v27 = vmul.f32 %v1922_v34, %v3038_v1 }
0x13d0   :  { %1931 = vrot.lane.b32.xlu0 %v1926_v27, %s2288_s19 }
0x1422   :  { %v1930_v40 = vpop.permute.xlu2 %1929 }
0x1423   :  { %2150 = vmatmul.msk.f32.vlgmr.msra.gmra.mxu2 %vm565_vm8, %v1930_v40 }
0x1442   :  { %v1932_v50 = vpop.permute.xlu0 %1931 }
0x1443   :  { %2151 = vmatmul.msk.f32.gmra.mxu2 %vm565_vm8, %v1932_v50 }
0x14a6   :  { %v1954_v8 = vpop.f32.mrf.mxu2 }
0x14a7   :  { %1962 = vrot.lane.b32.xlu1 %v1954_v8, %s2287_s18 }
0x14c6   :  { %v1957_v53 = vpop.f32.mrf.mxu2 }
0x14c7   :  { %1964 = vrot.lane.b32.xlu2 %v1957_v53, %s2287_s18 }
0x1519   :  { %v1963_v25 = vpop.permute.xlu1 %1962 }
0x151a   :  { %v1968_v0 = vadd.f32 %v1963_v25, %v3070_v2 }
0x151c   :  { %2257 = vtanh.f32 %v1968_v0 }
0x1521   :  { %v1965_v29 = vpop.permute.xlu2 %1964 }
0x1522   :  { %v2258_v20 = vpop.eup %2257  ;;  %v1969_v55 = vadd.f32 %v1965_v29, %v1853_v44 }
0x1523   :  { %1978 = vrot.lane.b32.xlu0 %v2258_v20, %s2288_s19 }
0x1524   :  { %2259 = vtanh.f32 %v1969_v55 }
0x152a   :  { %v2260_v60 = vpop.eup %2259 }
0x152b   :  { %1980 = vrot.lane.b32.xlu1 %v2260_v60, %s2288_s19 }
0x1595   :  { %v1979_v41 = vpop.permute.xlu0 %1978 }
0x1596   :  { %v1984_v57 = vmul.f32 %v1979_v41, %v1974_v52 }
0x1598   :  { %v1986_v61 = vadd.f32 %v1984_v57, %v1972_v38 }
0x159a   :  { %1990 = vrot.lane.b32.xlu2 %v1986_v61, %s2288_s19 }
0x159d   :  { %v1981_v56 = vpop.permute.xlu1 %1980 }
0x159e   :  { %v1985_v39 = vmul.f32 %v1981_v56, %v1975_v5 }
0x15a0   :  { %v1987_v12 = vadd.f32 %v1985_v39, %v1973_v58 }
0x15a2   :  { %1992 = vrot.lane.b32.xlu0 %v1987_v12, %s2288_s19 }
0x15f4   :  { %v1991_v14 = vpop.permute.xlu2 %1990 }
0x15f5   :  { %2152 = vmatmul.msk.f32.vlgmr.msra.gmra.mxu3 %vm565_vm8, %v1991_v14 }
0x1614   :  { %v1993_v62 = vpop.permute.xlu0 %1992 }
0x1615   :  { %2153 = vmatmul.msk.f32.gmra.mxu3 %vm565_vm8, %v1993_v62 }
0x1678   :  { %v2015_v2 = vpop.f32.mrf.mxu3 }
0x1679   :  { %v2016_v51 = vadd.f32 %v2960_v54, %v2015_v2 }
0x167b   :  { %2154 = vst.msk [vmem:[%s3111_s9 + $0x50] sm:$0xff] %vm496_vm2, %v2016_v51 }
0x1698   :  { %v2018_v48 = vpop.f32.mrf.mxu3 }
0x1699   :  { %v2019_v1 = vadd.f32 %v2960_v54, %v2018_v48 }
0x169b   :  { %2155 = vst.msk [vmem:[%s3111_s9 + $0x58] sm:$0xff] %vm496_vm2, %v2019_v1 }

</bundles_post_ra>
